<compile_context>
chip_gen: v7x
topology: tpu7x:2x2x1
jax: 0.10.0
libtpu: 0.0.40
codegen_flags: <defaults>
</compile_context>

<pallas_src>
import functools
import math

import jax
import jax.numpy as jnp
from jax import lax
from jax.experimental import pallas as pl
from jax.experimental.pallas import tpu as pltpu


# ----------------------------------------------------------------------------
# Fused multi-head-attention block kernel
#   out = LayerNorm(x_q + Wo @ MHA(x_q, x_kv, x_kv, mask))
# ----------------------------------------------------------------------------

def _mha_block_kernel(xq_ref, xkv_ref, mask_ref,
                      wq_ref, bq_ref, wkv_ref, bkv_ref, wo_ref, bo_ref,
                      g_ref, bln_ref, o_ref, *, num_heads, d_k):
    xq = xq_ref[0]            # (Sq, D) f32
    xkv = xkv_ref[0]          # (Sk, D) f32
    m = mask_ref[0]           # (Sq, Sk) f32 (shared across heads)
    D = num_heads * d_k

    xq_b = xq.astype(jnp.bfloat16)
    xkv_b = xkv.astype(jnp.bfloat16)

    # Fused projections: q = xq @ Wq, [k|v] = xkv @ Wkv  (bf16 MXU, f32 accum)
    q = jnp.dot(xq_b, wq_ref[...], preferred_element_type=jnp.float32) + bq_ref[...]
    kv = jnp.dot(xkv_b, wkv_ref[...], preferred_element_type=jnp.float32) + bkv_ref[...]
    k = kv[:, :D]
    v = kv[:, D:]

    scale = 1.0 / math.sqrt(d_k)
    ctx_heads = []
    for h in range(num_heads):            # static unroll over heads
        sl = slice(h * d_k, (h + 1) * d_k)
        qh = q[:, sl].astype(jnp.bfloat16)     # (Sq, dk)
        kh = k[:, sl].astype(jnp.bfloat16)     # (Sk, dk)
        vh = v[:, sl].astype(jnp.bfloat16)     # (Sk, dk)
        # scores = qh @ kh^T (contract on dk) -> (Sq, Sk), f32
        s = lax.dot_general(qh, kh, (((1,), (1,)), ((), ())),
                            preferred_element_type=jnp.float32) * scale
        s = jnp.where(m == 0.0, -1e9, s)       # masked_fill(mask == 0, -1e9)
        s = s - jnp.max(s, axis=-1, keepdims=True)
        e = jnp.exp(s)
        p = e * pl.reciprocal(jnp.sum(e, axis=-1, keepdims=True), approx=True)
        ctx_heads.append(jnp.dot(p.astype(jnp.bfloat16), vh,
                                 preferred_element_type=jnp.float32))
    ctx = jnp.concatenate(ctx_heads, axis=-1)      # (Sq, D), lane-dense

    attn_out = jnp.dot(ctx.astype(jnp.bfloat16), wo_ref[...],
                       preferred_element_type=jnp.float32) + bo_ref[...]

    # residual + LayerNorm (eps matches PyTorch default 1e-5), all in f32
    z = xq + attn_out
    mean = jnp.mean(z, axis=-1, keepdims=True)
    var = jnp.mean((z - mean) ** 2, axis=-1, keepdims=True)
    zn = (z - mean) * lax.rsqrt(var + 1e-5)
    o_ref[0] = zn * g_ref[...] + bln_ref[...]


def pallas_mha_block(xq, xkv, mask, p, gamma, beta, num_heads):
    """Fused MHA + residual + LayerNorm.  xq:(B,Sq,D), xkv:(B,Sk,D)."""
    B, Sq, D = xq.shape
    Sk = xkv.shape[1]
    d_k = D // num_heads
    # Mask is broadcast over heads inside the kernel (head dim of the provided
    # mask must be 1, as in the reference usage: (B,1,1,Sk) or (1,1,Sq,Sq)).
    m = jnp.broadcast_to(mask.astype(jnp.float32), (B, 1, Sq, Sk)).reshape(B, Sq, Sk)

    kernel = functools.partial(_mha_block_kernel, num_heads=num_heads, d_k=d_k)
    return pl.pallas_call(
        kernel,
        out_shape=jax.ShapeDtypeStruct((B, Sq, D), jnp.float32),
        grid=(B,),
        in_specs=[
            pl.BlockSpec((1, Sq, D), lambda b: (b, 0, 0)),
            pl.BlockSpec((1, Sk, D), lambda b: (b, 0, 0)),
            pl.BlockSpec((1, Sq, Sk), lambda b: (b, 0, 0)),
            pl.BlockSpec((D, D), lambda b: (0, 0)),        # wq  (bf16)
            pl.BlockSpec((1, D), lambda b: (0, 0)),        # bq
            pl.BlockSpec((D, 2 * D), lambda b: (0, 0)),    # wkv (bf16)
            pl.BlockSpec((1, 2 * D), lambda b: (0, 0)),    # bkv
            pl.BlockSpec((D, D), lambda b: (0, 0)),        # wo  (bf16)
            pl.BlockSpec((1, D), lambda b: (0, 0)),        # bo
            pl.BlockSpec((1, D), lambda b: (0, 0)),        # ln gamma
            pl.BlockSpec((1, D), lambda b: (0, 0)),        # ln beta
        ],
        out_specs=pl.BlockSpec((1, Sq, D), lambda b: (b, 0, 0)),
        compiler_params=pltpu.CompilerParams(dimension_semantics=("parallel",)),
    )(xq, xkv, m,
      p["wq"], p["bq"].reshape(1, D),
      p["wkv"], p["bkv"].reshape(1, 2 * D),
      p["wo"], p["bo"].reshape(1, D),
      gamma.reshape(1, D), beta.reshape(1, D))


# ----------------------------------------------------------------------------
# Fused feed-forward block kernel:  out = LayerNorm(x + W2 @ relu(W1 @ x))
# ----------------------------------------------------------------------------

def _ffn_block_kernel(x_ref, w1_ref, b1_ref, w2_ref, b2_ref, g_ref, bln_ref, o_ref):
    x = x_ref[...]                                        # (tm, D) f32
    h = jnp.dot(x.astype(jnp.bfloat16), w1_ref[...],
                preferred_element_type=jnp.float32) + b1_ref[...]
    h = jnp.maximum(h, 0.0)
    y = jnp.dot(h.astype(jnp.bfloat16), w2_ref[...],
                preferred_element_type=jnp.float32) + b2_ref[...]
    z = x + y
    mean = jnp.mean(z, axis=-1, keepdims=True)
    var = jnp.mean((z - mean) ** 2, axis=-1, keepdims=True)
    zn = (z - mean) * lax.rsqrt(var + 1e-5)
    o_ref[...] = zn * g_ref[...] + bln_ref[...]


def pallas_ffn_block(x2d, p, gamma, beta, tm=256):
    M, D = x2d.shape
    d_ff = p["w1"].shape[1]
    tm = min(tm, M)
    return pl.pallas_call(
        _ffn_block_kernel,
        out_shape=jax.ShapeDtypeStruct((M, D), jnp.float32),
        grid=(pl.cdiv(M, tm),),
        in_specs=[
            pl.BlockSpec((tm, D), lambda i: (i, 0)),
            pl.BlockSpec((D, d_ff), lambda i: (0, 0)),
            pl.BlockSpec((1, d_ff), lambda i: (0, 0)),
            pl.BlockSpec((d_ff, D), lambda i: (0, 0)),
            pl.BlockSpec((1, D), lambda i: (0, 0)),
            pl.BlockSpec((1, D), lambda i: (0, 0)),
            pl.BlockSpec((1, D), lambda i: (0, 0)),
        ],
        out_specs=pl.BlockSpec((tm, D), lambda i: (i, 0)),
        compiler_params=pltpu.CompilerParams(dimension_semantics=("parallel",)),
    )(x2d, p["w1"], p["b1"].reshape(1, d_ff), p["w2"], p["b2"].reshape(1, D),
      gamma.reshape(1, D), beta.reshape(1, D))


# ----------------------------------------------------------------------------
# Plain LayerNorm kernel (final encoder / decoder norms) — no zero-add input
# ----------------------------------------------------------------------------

def _ln_kernel(x_ref, g_ref, b_ref, o_ref):
    x = x_ref[...]
    mean = jnp.mean(x, axis=-1, keepdims=True)
    var = jnp.mean((x - mean) ** 2, axis=-1, keepdims=True)
    o_ref[...] = (x - mean) * lax.rsqrt(var + 1e-5) * g_ref[...] + b_ref[...]


def pallas_layernorm(x2d, gamma, beta, tm=512):
    M, D = x2d.shape
    tm = min(tm, M)
    return pl.pallas_call(
        _ln_kernel,
        out_shape=jax.ShapeDtypeStruct((M, D), jnp.float32),
        grid=(pl.cdiv(M, tm),),
        in_specs=[
            pl.BlockSpec((tm, D), lambda i: (i, 0)),
            pl.BlockSpec((1, D), lambda i: (0, 0)),
            pl.BlockSpec((1, D), lambda i: (0, 0)),
        ],
        out_specs=pl.BlockSpec((tm, D), lambda i: (i, 0)),
        compiler_params=pltpu.CompilerParams(dimension_semantics=("parallel",)),
    )(x2d, gamma.reshape(1, D), beta.reshape(1, D))


# ----------------------------------------------------------------------------
# Tiled linear (used only for the final vocab projection)
# ----------------------------------------------------------------------------

def _linear_kernel(x_ref, w_ref, b_ref, o_ref):
    o_ref[...] = jnp.dot(x_ref[...].astype(jnp.bfloat16), w_ref[...],
                         preferred_element_type=jnp.float32) + b_ref[...]


def pallas_linear(x, w, b, tm=256, tn=512):
    """x @ w + b.  x:(M,K) f32, w:(K,N) bf16, b:(N,) f32."""
    M, K = x.shape
    N = w.shape[1]
    tm = min(tm, M)
    tn = min(tn, N)
    return pl.pallas_call(
        _linear_kernel,
        out_shape=jax.ShapeDtypeStruct((M, N), jnp.float32),
        grid=(pl.cdiv(M, tm), pl.cdiv(N, tn)),
        in_specs=[
            pl.BlockSpec((tm, K), lambda i, j: (i, 0)),
            pl.BlockSpec((K, tn), lambda i, j: (0, j)),
            pl.BlockSpec((1, tn), lambda i, j: (0, j)),
        ],
        out_specs=pl.BlockSpec((tm, tn), lambda i, j: (i, j)),
        compiler_params=pltpu.CompilerParams(
            dimension_semantics=("parallel", "parallel")),
    )(x, w, b.reshape(1, N))


# ----------------------------------------------------------------------------
# Model glue (embedding gather, positional encoding, layer stacking)
# ----------------------------------------------------------------------------

def encoder_layer(p, src, src_mask, num_heads):
    src = pallas_mha_block(src, src, src_mask, p["self_attn"],
                           p["ln1_g"], p["ln1_b"], num_heads)
    B, S, D = src.shape
    src = pallas_ffn_block(src.reshape(B * S, D), p["ff"],
                           p["ln2_g"], p["ln2_b"]).reshape(B, S, D)
    return src


def decoder_layer(p, tgt, memory, tgt_mask, src_mask, num_heads):
    tgt = pallas_mha_block(tgt, tgt, tgt_mask, p["self_attn"],
                           p["ln1_g"], p["ln1_b"], num_heads)
    tgt = pallas_mha_block(tgt, memory, src_mask, p["src_attn"],
                           p["ln2_g"], p["ln2_b"], num_heads)
    B, S, D = tgt.shape
    tgt = pallas_ffn_block(tgt.reshape(B * S, D), p["ff"],
                           p["ln3_g"], p["ln3_b"]).reshape(B, S, D)
    return tgt


def transformer_forward(params, src, tgt, src_mask, tgt_mask, d_model, num_heads):
    # Embedding gather stays in JAX glue (data-dependent gather).
    src_embed = params["src_emb"][src] * math.sqrt(d_model)   # (B, S_src, D)
    tgt_embed = params["tgt_emb"][tgt] * math.sqrt(d_model)   # (B, S_tgt, D)

    # PositionalEncoding: pe has shape (max_len, 1, d_model) and the reference
    # module indexes it with x.size(0) == batch (broadcasting over the sequence
    # dim).  Reproduced exactly to match the PyTorch module's semantics.
    pe = params["pe"]
    src_x = src_embed + pe[: src_embed.shape[0]]
    tgt_x = tgt_embed + pe[: tgt_embed.shape[0]]

    # Encoder
    mem = src_x
    for lp in params["enc_layers"]:
        mem = encoder_layer(lp, mem, src_mask, num_heads)
    B, S, D = mem.shape
    mem = pallas_layernorm(mem.reshape(B * S, D),
                           params["enc_norm_g"], params["enc_norm_b"]).reshape(B, S, D)

    # Decoder
    out = tgt_x
    for lp in params["dec_layers"]:
        out = decoder_layer(lp, out, mem, tgt_mask, src_mask, num_heads)
    Bt, St, D = out.shape
    out = pallas_layernorm(out.reshape(Bt * St, D),
                           params["dec_norm_g"], params["dec_norm_b"]).reshape(Bt, St, D)

    # Final projection to vocab
    logits = pallas_linear(out.reshape(Bt * St, D), params["fc_w"], params["fc_b"])
    return logits.reshape(Bt, St, -1)


# ----------------------------------------------------------------------------
# Deterministic parameter construction
# ----------------------------------------------------------------------------

def make_positional_encoding(d_model, max_len=512):
    position = jnp.arange(max_len, dtype=jnp.float32)[:, None]
    div_term = jnp.exp(jnp.arange(0, d_model, 2, dtype=jnp.float32)
                       * (-math.log(10000.0) / d_model))
    ang = position * div_term
    pe = jnp.zeros((max_len, d_model), jnp.float32)
    pe = pe.at[:, 0::2].set(jnp.sin(ang))
    pe = pe.at[:, 1::2].set(jnp.cos(ang))
    return pe[:, None, :]  # (max_len, 1, d_model)


def init_params(key, src_vocab, tgt_vocab, d_model, num_heads,
                num_encoder_layers, num_decoder_layers, d_ff):
    keys = iter(jax.random.split(key, 1024))

    def lin(in_dim, out_dim):
        bound = 1.0 / math.sqrt(in_dim)
        w = jax.random.uniform(next(keys), (in_dim, out_dim), jnp.float32, -bound, bound)
        b = jax.random.uniform(next(keys), (out_dim,), jnp.float32, -bound, bound)
        return w, b

    def mha_params():
        wq, bq = lin(d_model, d_model)
        wk, bk = lin(d_model, d_model)
        wv, bv = lin(d_model, d_model)
        wo, bo = lin(d_model, d_model)
        return {
            "wq": wq.astype(jnp.bfloat16), "bq": bq,
            "wkv": jnp.concatenate([wk, wv], axis=1).astype(jnp.bfloat16),
            "bkv": jnp.concatenate([bk, bv], axis=0),
            "wo": wo.astype(jnp.bfloat16), "bo": bo,
        }

    def ff_params():
        w1, b1 = lin(d_model, d_ff)
        w2, b2 = lin(d_ff, d_model)
        return {"w1": w1.astype(jnp.bfloat16), "b1": b1,
                "w2": w2.astype(jnp.bfloat16), "b2": b2}

    def ln_params():
        return jnp.ones((d_model,), jnp.float32), jnp.zeros((d_model,), jnp.float32)

    enc_layers = []
    for _ in range(num_encoder_layers):
        g1, b1 = ln_params()
        g2, b2 = ln_params()
        enc_layers.append({"self_attn": mha_params(), "ff": ff_params(),
                           "ln1_g": g1, "ln1_b": b1, "ln2_g": g2, "ln2_b": b2})

    dec_layers = []
    for _ in range(num_decoder_layers):
        g1, b1 = ln_params()
        g2, b2 = ln_params()
        g3, b3 = ln_params()
        dec_layers.append({"self_attn": mha_params(), "src_attn": mha_params(),
                           "ff": ff_params(),
                           "ln1_g": g1, "ln1_b": b1, "ln2_g": g2, "ln2_b": b2,
                           "ln3_g": g3, "ln3_b": b3})

    fc_w, fc_b = lin(d_model, tgt_vocab)
    enc_g, enc_b = ln_params()
    dec_g, dec_b = ln_params()

    return {
        "src_emb": jax.random.normal(next(keys), (src_vocab, d_model), jnp.float32),
        "tgt_emb": jax.random.normal(next(keys), (tgt_vocab, d_model), jnp.float32),
        "pe": make_positional_encoding(d_model),
        "enc_layers": enc_layers,
        "dec_layers": dec_layers,
        "enc_norm_g": enc_g, "enc_norm_b": enc_b,
        "dec_norm_g": dec_g, "dec_norm_b": dec_b,
        "fc_w": fc_w.astype(jnp.bfloat16), "fc_b": fc_b,
    }


# ----------------------------------------------------------------------------
# Main
# ----------------------------------------------------------------------------

if __name__ == "__main__":
    src_vocab_size, tgt_vocab_size = 50, 60
    d_model, num_heads, d_ff = 32, 4, 64
    num_encoder_layers, num_decoder_layers = 2, 2
    B, S_src, S_tgt = 2, 8, 8

    key = jax.random.PRNGKey(0)
    kp, ks, kt = jax.random.split(key, 3)

    params = init_params(kp, src_vocab_size, tgt_vocab_size, d_model, num_heads,
                         num_encoder_layers, num_decoder_layers, d_ff)

    src = jax.random.randint(ks, (B, S_src), 0, src_vocab_size, dtype=jnp.int32)
    tgt = jax.random.randint(kt, (B, S_tgt), 0, tgt_vocab_size, dtype=jnp.int32)
    src_mask = jnp.ones((B, 1, 1, S_src), jnp.float32)                      # all-visible
    tgt_mask = jnp.tril(jnp.ones((S_tgt, S_tgt), jnp.float32))[None, None]  # causal

    fwd = jax.jit(functools.partial(transformer_forward,
                                    d_model=d_model, num_heads=num_heads))
    out = fwd(params, src, tgt, src_mask, tgt_mask)
    out = jax.block_until_ready(out)
    assert out.shape == (B, S_tgt, tgt_vocab_size) and out.dtype == jnp.float32
    print("KERNEL_OK")
</pallas_src>

<mosaic_0001>
module attributes {stable_mosaic.version = 11 : i64} {
  func.func @_ffn_block_kernel(%arg0: i32, %arg1: memref<16x32xf32, #tpu.memory_space<vmem>>, %arg2: memref<32x64xbf16, #tpu.memory_space<vmem>>, %arg3: memref<1x64xf32, #tpu.memory_space<vmem>>, %arg4: memref<64x32xbf16, #tpu.memory_space<vmem>>, %arg5: memref<1x32xf32, #tpu.memory_space<vmem>>, %arg6: memref<1x32xf32, #tpu.memory_space<vmem>>, %arg7: memref<1x32xf32, #tpu.memory_space<vmem>>, %arg8: memref<16x32xf32, #tpu.memory_space<vmem>>) attributes {dimension_semantics = [#tpu.dimension_semantics<parallel>], iteration_bounds = array<i64: 1>, scalar_prefetch = 0 : i64, scratch_operands = 0 : i64, tpu.core_type = #tpu.core_type<tc>, window_params = [{transform_indices = @transform_0, window_bounds = array<i64: 16, 32>}, {pipeline_mode = #tpu.pipeline_mode<synchronous>, transform_indices = @transform_1, window_bounds = array<i64: 32, 64>}, {pipeline_mode = #tpu.pipeline_mode<synchronous>, transform_indices = @transform_2, window_bounds = array<i64: 1, 64>}, {pipeline_mode = #tpu.pipeline_mode<synchronous>, transform_indices = @transform_3, window_bounds = array<i64: 64, 32>}, {pipeline_mode = #tpu.pipeline_mode<synchronous>, transform_indices = @transform_4, window_bounds = array<i64: 1, 32>}, {pipeline_mode = #tpu.pipeline_mode<synchronous>, transform_indices = @transform_5, window_bounds = array<i64: 1, 32>}, {pipeline_mode = #tpu.pipeline_mode<synchronous>, transform_indices = @transform_6, window_bounds = array<i64: 1, 32>}, {transform_indices = @transform_7, window_bounds = array<i64: 16, 32>}]} {
    %c0 = arith.constant 0 : index
    %c0_0 = arith.constant 0 : index
    %0 = vector.load %arg1[%c0, %c0_0] : memref<16x32xf32, #tpu.memory_space<vmem>>, vector<16x32xf32>
    %1 = arith.truncf %0 : vector<16x32xf32> to vector<16x32xbf16>
    %c0_1 = arith.constant 0 : index
    %c0_2 = arith.constant 0 : index
    %2 = vector.load %arg2[%c0_1, %c0_2] : memref<32x64xbf16, #tpu.memory_space<vmem>>, vector<32x64xbf16>
    %cst = arith.constant dense<0.000000e+00> : vector<16x64xf32>
    %3 = tpu.matmul %1, %2, %cst {dimension_numbers = #tpu.dot_dimension_numbers<[1], [0], [0], [1], [0, 0, 1, 1], [], []>} : vector<16x32xbf16>, vector<32x64xbf16>, vector<16x64xf32> -> vector<16x64xf32>
    %c0_3 = arith.constant 0 : index
    %c0_4 = arith.constant 0 : index
    %4 = vector.load %arg3[%c0_3, %c0_4] : memref<1x64xf32, #tpu.memory_space<vmem>>, vector<1x64xf32>
    %5 = vector.broadcast %4 : vector<1x64xf32> to vector<16x64xf32>
    %6 = arith.addf %3, %5 : vector<16x64xf32>
    %cst_5 = arith.constant 0.000000e+00 : f32
    %7 = vector.broadcast %cst_5 : f32 to vector<16x64xf32>
    %8 = arith.maximumf %6, %7 : vector<16x64xf32>
    %9 = arith.truncf %8 : vector<16x64xf32> to vector<16x64xbf16>
    %c0_6 = arith.constant 0 : index
    %c0_7 = arith.constant 0 : index
    %10 = vector.load %arg4[%c0_6, %c0_7] : memref<64x32xbf16, #tpu.memory_space<vmem>>, vector<64x32xbf16>
    %cst_8 = arith.constant dense<0.000000e+00> : vector<16x32xf32>
    %11 = tpu.matmul %9, %10, %cst_8 {dimension_numbers = #tpu.dot_dimension_numbers<[1], [0], [0], [1], [0, 0, 1, 1], [], []>} : vector<16x64xbf16>, vector<64x32xbf16>, vector<16x32xf32> -> vector<16x32xf32>
    %c0_9 = arith.constant 0 : index
    %c0_10 = arith.constant 0 : index
    %12 = vector.load %arg5[%c0_9, %c0_10] : memref<1x32xf32, #tpu.memory_space<vmem>>, vector<1x32xf32>
    %13 = vector.broadcast %12 : vector<1x32xf32> to vector<16x32xf32>
    %14 = arith.addf %11, %13 : vector<16x32xf32>
    %15 = arith.addf %0, %14 : vector<16x32xf32>
    %cst_11 = arith.constant dense<0.000000e+00> : vector<16xf32>
    %16 = vector.multi_reduction <add>, %15, %cst_11 [1] : vector<16x32xf32> to vector<16xf32>
    %17 = vector.shape_cast %16 : vector<16xf32> to vector<16x1xf32>
    %cst_12 = arith.constant 3.200000e+01 : f32
    %18 = vector.broadcast %cst_12 : f32 to vector<16x1xf32>
    %19 = arith.divf %17, %18 : vector<16x1xf32>
    %20 = vector.broadcast %19 : vector<16x1xf32> to vector<16x32xf32>
    %21 = arith.subf %15, %20 : vector<16x32xf32>
    %22 = arith.mulf %21, %21 : vector<16x32xf32>
    %cst_13 = arith.constant dense<0.000000e+00> : vector<16xf32>
    %23 = vector.multi_reduction <add>, %22, %cst_13 [1] : vector<16x32xf32> to vector<16xf32>
    %24 = vector.shape_cast %23 : vector<16xf32> to vector<16x1xf32>
    %cst_14 = arith.constant 3.200000e+01 : f32
    %25 = vector.broadcast %cst_14 : f32 to vector<16x1xf32>
    %26 = arith.divf %24, %25 : vector<16x1xf32>
    %27 = vector.broadcast %19 : vector<16x1xf32> to vector<16x32xf32>
    %28 = arith.subf %15, %27 : vector<16x32xf32>
    %cst_15 = arith.constant 9.99999974E-6 : f32
    %29 = vector.broadcast %cst_15 : f32 to vector<16x1xf32>
    %30 = arith.addf %26, %29 : vector<16x1xf32>
    %31 = math.rsqrt %30 : vector<16x1xf32>
    %32 = vector.broadcast %31 : vector<16x1xf32> to vector<16x32xf32>
    %33 = arith.mulf %28, %32 : vector<16x32xf32>
    %c0_16 = arith.constant 0 : index
    %c0_17 = arith.constant 0 : index
    %34 = vector.load %arg6[%c0_16, %c0_17] : memref<1x32xf32, #tpu.memory_space<vmem>>, vector<1x32xf32>
    %35 = vector.broadcast %34 : vector<1x32xf32> to vector<16x32xf32>
    %36 = arith.mulf %33, %35 : vector<16x32xf32>
    %c0_18 = arith.constant 0 : index
    %c0_19 = arith.constant 0 : index
    %37 = vector.load %arg7[%c0_18, %c0_19] : memref<1x32xf32, #tpu.memory_space<vmem>>, vector<1x32xf32>
    %38 = vector.broadcast %37 : vector<1x32xf32> to vector<16x32xf32>
    %39 = arith.addf %36, %38 : vector<16x32xf32>
    %c0_20 = arith.constant 0 : index
    %c0_21 = arith.constant 0 : index
    %40 = vector.load %arg8[%c0_20, %c0_21] : memref<16x32xf32, #tpu.memory_space<vmem>>, vector<16x32xf32>
    tpu.vector_store %arg8[%c0_20, %c0_21], %39 {strides = array<i32>} : memref<16x32xf32, #tpu.memory_space<vmem>>, vector<16x32xf32>,
    return
  }
  func.func @transform_0(%arg0: i32) -> (i32, i32) {
    %c0_i32 = arith.constant 0 : i32
    %c0_i32_0 = arith.constant 0 : i32
    return %arg0, %c0_i32 : i32, i32
  }
  func.func @transform_1(%arg0: i32) -> (i32, i32) {
    %c0_i32 = arith.constant 0 : i32
    %c0_i32_0 = arith.constant 0 : i32
    %c0_i32_1 = arith.constant 0 : i32
    return %c0_i32, %c0_i32_0 : i32, i32
  }
  func.func @transform_2(%arg0: i32) -> (i32, i32) {
    %c0_i32 = arith.constant 0 : i32
    %c0_i32_0 = arith.constant 0 : i32
    %c0_i32_1 = arith.constant 0 : i32
    return %c0_i32, %c0_i32_0 : i32, i32
  }
  func.func @transform_3(%arg0: i32) -> (i32, i32) {
    %c0_i32 = arith.constant 0 : i32
    %c0_i32_0 = arith.constant 0 : i32
    %c0_i32_1 = arith.constant 0 : i32
    return %c0_i32, %c0_i32_0 : i32, i32
  }
  func.func @transform_4(%arg0: i32) -> (i32, i32) {
    %c0_i32 = arith.constant 0 : i32
    %c0_i32_0 = arith.constant 0 : i32
    %c0_i32_1 = arith.constant 0 : i32
    return %c0_i32, %c0_i32_0 : i32, i32
  }
  func.func @transform_5(%arg0: i32) -> (i32, i32) {
    %c0_i32 = arith.constant 0 : i32
    %c0_i32_0 = arith.constant 0 : i32
    %c0_i32_1 = arith.constant 0 : i32
    return %c0_i32, %c0_i32_0 : i32, i32
  }
  func.func @transform_6(%arg0: i32) -> (i32, i32) {
    %c0_i32 = arith.constant 0 : i32
    %c0_i32_0 = arith.constant 0 : i32
    %c0_i32_1 = arith.constant 0 : i32
    return %c0_i32, %c0_i32_0 : i32, i32
  }
  func.func @transform_7(%arg0: i32) -> (i32, i32) {
    %c0_i32 = arith.constant 0 : i32
    %c0_i32_0 = arith.constant 0 : i32
    return %arg0, %c0_i32 : i32, i32
  }
}

module attributes {stable_mosaic.version = 11 : i64} {
  func.func @_mha_block_kernel(%arg0: i32, %arg1: memref<1x8x32xf32, #tpu.memory_space<vmem>>, %arg2: memref<1x8x32xf32, #tpu.memory_space<vmem>>, %arg3: memref<1x8x8xf32, #tpu.memory_space<vmem>>, %arg4: memref<32x32xbf16, #tpu.memory_space<vmem>>, %arg5: memref<1x32xf32, #tpu.memory_space<vmem>>, %arg6: memref<32x64xbf16, #tpu.memory_space<vmem>>, %arg7: memref<1x64xf32, #tpu.memory_space<vmem>>, %arg8: memref<32x32xbf16, #tpu.memory_space<vmem>>, %arg9: memref<1x32xf32, #tpu.memory_space<vmem>>, %arg10: memref<1x32xf32, #tpu.memory_space<vmem>>, %arg11: memref<1x32xf32, #tpu.memory_space<vmem>>, %arg12: memref<1x8x32xf32, #tpu.memory_space<vmem>>) attributes {dimension_semantics = [#tpu.dimension_semantics<parallel>], iteration_bounds = array<i64: 2>, scalar_prefetch = 0 : i64, scratch_operands = 0 : i64, tpu.core_type = #tpu.core_type<tc>, window_params = [{transform_indices = @transform_0, window_bounds = array<i64: 1, 8, 32>}, {transform_indices = @transform_1, window_bounds = array<i64: 1, 8, 32>}, {transform_indices = @transform_2, window_bounds = array<i64: 1, 8, 8>}, {pipeline_mode = #tpu.pipeline_mode<synchronous>, transform_indices = @transform_3, window_bounds = array<i64: 32, 32>}, {pipeline_mode = #tpu.pipeline_mode<synchronous>, transform_indices = @transform_4, window_bounds = array<i64: 1, 32>}, {pipeline_mode = #tpu.pipeline_mode<synchronous>, transform_indices = @transform_5, window_bounds = array<i64: 32, 64>}, {pipeline_mode = #tpu.pipeline_mode<synchronous>, transform_indices = @transform_6, window_bounds = array<i64: 1, 64>}, {pipeline_mode = #tpu.pipeline_mode<synchronous>, transform_indices = @transform_7, window_bounds = array<i64: 32, 32>}, {pipeline_mode = #tpu.pipeline_mode<synchronous>, transform_indices = @transform_8, window_bounds = array<i64: 1, 32>}, {pipeline_mode = #tpu.pipeline_mode<synchronous>, transform_indices = @transform_9, window_bounds = array<i64: 1, 32>}, {pipeline_mode = #tpu.pipeline_mode<synchronous>, transform_indices = @transform_10, window_bounds = array<i64: 1, 32>}, {transform_indices = @transform_11, window_bounds = array<i64: 1, 8, 32>}]} {
    %c0 = arith.constant 0 : index
    %c0_0 = arith.constant 0 : index
    %c0_1 = arith.constant 0 : index
    %0 = vector.load %arg1[%c0, %c0_0, %c0_1] : memref<1x8x32xf32, #tpu.memory_space<vmem>>, vector<1x8x32xf32>
    %1 = vector.shape_cast %0 : vector<1x8x32xf32> to vector<8x32xf32>
    %c0_2 = arith.constant 0 : index
    %c0_3 = arith.constant 0 : index
    %c0_4 = arith.constant 0 : index
    %2 = vector.load %arg2[%c0_2, %c0_3, %c0_4] : memref<1x8x32xf32, #tpu.memory_space<vmem>>, vector<1x8x32xf32>
    %3 = vector.shape_cast %2 : vector<1x8x32xf32> to vector<8x32xf32>
    %c0_5 = arith.constant 0 : index
    %c0_6 = arith.constant 0 : index
    %c0_7 = arith.constant 0 : index
    %4 = vector.load %arg3[%c0_5, %c0_6, %c0_7] : memref<1x8x8xf32, #tpu.memory_space<vmem>>, vector<1x8x8xf32>
    %5 = vector.shape_cast %4 : vector<1x8x8xf32> to vector<8x8xf32>
    %6 = arith.truncf %1 : vector<8x32xf32> to vector<8x32xbf16>
    %7 = arith.truncf %3 : vector<8x32xf32> to vector<8x32xbf16>
    %c0_8 = arith.constant 0 : index
    %c0_9 = arith.constant 0 : index
    %8 = vector.load %arg4[%c0_8, %c0_9] : memref<32x32xbf16, #tpu.memory_space<vmem>>, vector<32x32xbf16>
    %cst = arith.constant dense<0.000000e+00> : vector<8x32xf32>
    %9 = tpu.matmul %6, %8, %cst {dimension_numbers = #tpu.dot_dimension_numbers<[1], [0], [0], [1], [0, 0, 1, 1], [], []>} : vector<8x32xbf16>, vector<32x32xbf16>, vector<8x32xf32> -> vector<8x32xf32>
    %c0_10 = arith.constant 0 : index
    %c0_11 = arith.constant 0 : index
    %10 = vector.load %arg5[%c0_10, %c0_11] : memref<1x32xf32, #tpu.memory_space<vmem>>, vector<1x32xf32>
    %11 = vector.broadcast %10 : vector<1x32xf32> to vector<8x32xf32>
    %12 = arith.addf %9, %11 : vector<8x32xf32>
    %c0_12 = arith.constant 0 : index
    %c0_13 = arith.constant 0 : index
    %13 = vector.load %arg6[%c0_12, %c0_13] : memref<32x64xbf16, #tpu.memory_space<vmem>>, vector<32x64xbf16>
    %cst_14 = arith.constant dense<0.000000e+00> : vector<8x64xf32>
    %14 = tpu.matmul %7, %13, %cst_14 {dimension_numbers = #tpu.dot_dimension_numbers<[1], [0], [0], [1], [0, 0, 1, 1], [], []>} : vector<8x32xbf16>, vector<32x64xbf16>, vector<8x64xf32> -> vector<8x64xf32>
    %c0_15 = arith.constant 0 : index
    %c0_16 = arith.constant 0 : index
    %15 = vector.load %arg7[%c0_15, %c0_16] : memref<1x64xf32, #tpu.memory_space<vmem>>, vector<1x64xf32>
    %16 = vector.broadcast %15 : vector<1x64xf32> to vector<8x64xf32>
    %17 = arith.addf %14, %16 : vector<8x64xf32>
    %18 = vector.extract_strided_slice %17 {offsets = [0, 0], sizes = [8, 32], strides = [1, 1]} : vector<8x64xf32> to vector<8x32xf32>
    %19 = vector.extract_strided_slice %17 {offsets = [0, 32], sizes = [8, 32], strides = [1, 1]} : vector<8x64xf32> to vector<8x32xf32>
    %20 = vector.extract_strided_slice %12 {offsets = [0, 0], sizes = [8, 8], strides = [1, 1]} : vector<8x32xf32> to vector<8x8xf32>
    %21 = arith.truncf %20 : vector<8x8xf32> to vector<8x8xbf16>
    %22 = vector.extract_strided_slice %18 {offsets = [0, 0], sizes = [8, 8], strides = [1, 1]} : vector<8x32xf32> to vector<8x8xf32>
    %23 = arith.truncf %22 : vector<8x8xf32> to vector<8x8xbf16>
    %24 = vector.extract_strided_slice %19 {offsets = [0, 0], sizes = [8, 8], strides = [1, 1]} : vector<8x32xf32> to vector<8x8xf32>
    %25 = arith.truncf %24 : vector<8x8xf32> to vector<8x8xbf16>
    %cst_17 = arith.constant dense<0.000000e+00> : vector<8x8xf32>
    %26 = tpu.matmul %21, %23, %cst_17 {dimension_numbers = #tpu.dot_dimension_numbers<[1], [1], [0], [0], [0, 0, 1, 0], [], []>} : vector<8x8xbf16>, vector<8x8xbf16>, vector<8x8xf32> -> vector<8x8xf32>
    %cst_18 = arith.constant 0.353553385 : f32
    %27 = vector.broadcast %cst_18 : f32 to vector<8x8xf32>
    %28 = arith.mulf %26, %27 : vector<8x8xf32>
    %cst_19 = arith.constant 0.000000e+00 : f32
    %29 = vector.broadcast %cst_19 : f32 to vector<8x8xf32>
    %30 = arith.cmpf oeq, %5, %29 : vector<8x8xf32>
    %cst_20 = arith.constant -1.000000e+09 : f32
    %31 = vector.broadcast %cst_20 : f32 to vector<8x8xf32>
    %32 = arith.select %30, %31, %28 : vector<8x8xi1>, vector<8x8xf32>
    %cst_21 = arith.constant dense<0xFF800000> : vector<8xf32>
    %33 = vector.multi_reduction <maximumf>, %32, %cst_21 [1] : vector<8x8xf32> to vector<8xf32>
    %34 = vector.shape_cast %33 : vector<8xf32> to vector<8x1xf32>
    %35 = vector.broadcast %34 : vector<8x1xf32> to vector<8x8xf32>
    %36 = arith.subf %32, %35 : vector<8x8xf32>
    %37 = math.exp %36 : vector<8x8xf32>
    %cst_22 = arith.constant dense<0.000000e+00> : vector<8xf32>
    %38 = vector.multi_reduction <add>, %37, %cst_22 [1] : vector<8x8xf32> to vector<8xf32>
    %39 = vector.shape_cast %38 : vector<8xf32> to vector<8x1xf32>
    %40 = tpu.reciprocal %39 {approx = true} : vector<8x1xf32> -> vector<8x1xf32>
    %41 = vector.broadcast %40 : vector<8x1xf32> to vector<8x8xf32>
    %42 = arith.mulf %37, %41 : vector<8x8xf32>
    %43 = arith.truncf %42 : vector<8x8xf32> to vector<8x8xbf16>
    %cst_23 = arith.constant dense<0.000000e+00> : vector<8x8xf32>
    %44 = tpu.matmul %43, %25, %cst_23 {dimension_numbers = #tpu.dot_dimension_numbers<[1], [0], [0], [1], [0, 0, 1, 1], [], []>} : vector<8x8xbf16>, vector<8x8xbf16>, vector<8x8xf32> -> vector<8x8xf32>
    %45 = vector.extract_strided_slice %12 {offsets = [0, 8], sizes = [8, 8], strides = [1, 1]} : vector<8x32xf32> to vector<8x8xf32>
    %46 = arith.truncf %45 : vector<8x8xf32> to vector<8x8xbf16>
    %47 = vector.extract_strided_slice %18 {offsets = [0, 8], sizes = [8, 8], strides = [1, 1]} : vector<8x32xf32> to vector<8x8xf32>
    %48 = arith.truncf %47 : vector<8x8xf32> to vector<8x8xbf16>
    %49 = vector.extract_strided_slice %19 {offsets = [0, 8], sizes = [8, 8], strides = [1, 1]} : vector<8x32xf32> to vector<8x8xf32>
    %50 = arith.truncf %49 : vector<8x8xf32> to vector<8x8xbf16>
    %cst_24 = arith.constant dense<0.000000e+00> : vector<8x8xf32>
    %51 = tpu.matmul %46, %48, %cst_24 {dimension_numbers = #tpu.dot_dimension_numbers<[1], [1], [0], [0], [0, 0, 1, 0], [], []>} : vector<8x8xbf16>, vector<8x8xbf16>, vector<8x8xf32> -> vector<8x8xf32>
    %cst_25 = arith.constant 0.353553385 : f32
    %52 = vector.broadcast %cst_25 : f32 to vector<8x8xf32>
    %53 = arith.mulf %51, %52 : vector<8x8xf32>
    %cst_26 = arith.constant 0.000000e+00 : f32
    %54 = vector.broadcast %cst_26 : f32 to vector<8x8xf32>
    %55 = arith.cmpf oeq, %5, %54 : vector<8x8xf32>
    %cst_27 = arith.constant -1.000000e+09 : f32
    %56 = vector.broadcast %cst_27 : f32 to vector<8x8xf32>
    %57 = arith.select %55, %56, %53 : vector<8x8xi1>, vector<8x8xf32>
    %cst_28 = arith.constant dense<0xFF800000> : vector<8xf32>
    %58 = vector.multi_reduction <maximumf>, %57, %cst_28 [1] : vector<8x8xf32> to vector<8xf32>
    %59 = vector.shape_cast %58 : vector<8xf32> to vector<8x1xf32>
    %60 = vector.broadcast %59 : vector<8x1xf32> to vector<8x8xf32>
    %61 = arith.subf %57, %60 : vector<8x8xf32>
    %62 = math.exp %61 : vector<8x8xf32>
    %cst_29 = arith.constant dense<0.000000e+00> : vector<8xf32>
    %63 = vector.multi_reduction <add>, %62, %cst_29 [1] : vector<8x8xf32> to vector<8xf32>
    %64 = vector.shape_cast %63 : vector<8xf32> to vector<8x1xf32>
    %65 = tpu.reciprocal %64 {approx = true} : vector<8x1xf32> -> vector<8x1xf32>
    %66 = vector.broadcast %65 : vector<8x1xf32> to vector<8x8xf32>
    %67 = arith.mulf %62, %66 : vector<8x8xf32>
    %68 = arith.truncf %67 : vector<8x8xf32> to vector<8x8xbf16>
    %cst_30 = arith.constant dense<0.000000e+00> : vector<8x8xf32>
    %69 = tpu.matmul %68, %50, %cst_30 {dimension_numbers = #tpu.dot_dimension_numbers<[1], [0], [0], [1], [0, 0, 1, 1], [], []>} : vector<8x8xbf16>, vector<8x8xbf16>, vector<8x8xf32> -> vector<8x8xf32>
    %70 = vector.extract_strided_slice %12 {offsets = [0, 16], sizes = [8, 8], strides = [1, 1]} : vector<8x32xf32> to vector<8x8xf32>
    %71 = arith.truncf %70 : vector<8x8xf32> to vector<8x8xbf16>
    %72 = vector.extract_strided_slice %18 {offsets = [0, 16], sizes = [8, 8], strides = [1, 1]} : vector<8x32xf32> to vector<8x8xf32>
    %73 = arith.truncf %72 : vector<8x8xf32> to vector<8x8xbf16>
    %74 = vector.extract_strided_slice %19 {offsets = [0, 16], sizes = [8, 8], strides = [1, 1]} : vector<8x32xf32> to vector<8x8xf32>
    %75 = arith.truncf %74 : vector<8x8xf32> to vector<8x8xbf16>
    %cst_31 = arith.constant dense<0.000000e+00> : vector<8x8xf32>
    %76 = tpu.matmul %71, %73, %cst_31 {dimension_numbers = #tpu.dot_dimension_numbers<[1], [1], [0], [0], [0, 0, 1, 0], [], []>} : vector<8x8xbf16>, vector<8x8xbf16>, vector<8x8xf32> -> vector<8x8xf32>
    %cst_32 = arith.constant 0.353553385 : f32
    %77 = vector.broadcast %cst_32 : f32 to vector<8x8xf32>
    %78 = arith.mulf %76, %77 : vector<8x8xf32>
    %cst_33 = arith.constant 0.000000e+00 : f32
    %79 = vector.broadcast %cst_33 : f32 to vector<8x8xf32>
    %80 = arith.cmpf oeq, %5, %79 : vector<8x8xf32>
    %cst_34 = arith.constant -1.000000e+09 : f32
    %81 = vector.broadcast %cst_34 : f32 to vector<8x8xf32>
    %82 = arith.select %80, %81, %78 : vector<8x8xi1>, vector<8x8xf32>
    %cst_35 = arith.constant dense<0xFF800000> : vector<8xf32>
    %83 = vector.multi_reduction <maximumf>, %82, %cst_35 [1] : vector<8x8xf32> to vector<8xf32>
    %84 = vector.shape_cast %83 : vector<8xf32> to vector<8x1xf32>
    %85 = vector.broadcast %84 : vector<8x1xf32> to vector<8x8xf32>
    %86 = arith.subf %82, %85 : vector<8x8xf32>
    %87 = math.exp %86 : vector<8x8xf32>
    %cst_36 = arith.constant dense<0.000000e+00> : vector<8xf32>
    %88 = vector.multi_reduction <add>, %87, %cst_36 [1] : vector<8x8xf32> to vector<8xf32>
    %89 = vector.shape_cast %88 : vector<8xf32> to vector<8x1xf32>
    %90 = tpu.reciprocal %89 {approx = true} : vector<8x1xf32> -> vector<8x1xf32>
    %91 = vector.broadcast %90 : vector<8x1xf32> to vector<8x8xf32>
    %92 = arith.mulf %87, %91 : vector<8x8xf32>
    %93 = arith.truncf %92 : vector<8x8xf32> to vector<8x8xbf16>
    %cst_37 = arith.constant dense<0.000000e+00> : vector<8x8xf32>
    %94 = tpu.matmul %93, %75, %cst_37 {dimension_numbers = #tpu.dot_dimension_numbers<[1], [0], [0], [1], [0, 0, 1, 1], [], []>} : vector<8x8xbf16>, vector<8x8xbf16>, vector<8x8xf32> -> vector<8x8xf32>
    %95 = vector.extract_strided_slice %12 {offsets = [0, 24], sizes = [8, 8], strides = [1, 1]} : vector<8x32xf32> to vector<8x8xf32>
    %96 = arith.truncf %95 : vector<8x8xf32> to vector<8x8xbf16>
    %97 = vector.extract_strided_slice %18 {offsets = [0, 24], sizes = [8, 8], strides = [1, 1]} : vector<8x32xf32> to vector<8x8xf32>
    %98 = arith.truncf %97 : vector<8x8xf32> to vector<8x8xbf16>
    %99 = vector.extract_strided_slice %19 {offsets = [0, 24], sizes = [8, 8], strides = [1, 1]} : vector<8x32xf32> to vector<8x8xf32>
    %100 = arith.truncf %99 : vector<8x8xf32> to vector<8x8xbf16>
    %cst_38 = arith.constant dense<0.000000e+00> : vector<8x8xf32>
    %101 = tpu.matmul %96, %98, %cst_38 {dimension_numbers = #tpu.dot_dimension_numbers<[1], [1], [0], [0], [0, 0, 1, 0], [], []>} : vector<8x8xbf16>, vector<8x8xbf16>, vector<8x8xf32> -> vector<8x8xf32>
    %cst_39 = arith.constant 0.353553385 : f32
    %102 = vector.broadcast %cst_39 : f32 to vector<8x8xf32>
    %103 = arith.mulf %101, %102 : vector<8x8xf32>
    %cst_40 = arith.constant 0.000000e+00 : f32
    %104 = vector.broadcast %cst_40 : f32 to vector<8x8xf32>
    %105 = arith.cmpf oeq, %5, %104 : vector<8x8xf32>
    %cst_41 = arith.constant -1.000000e+09 : f32
    %106 = vector.broadcast %cst_41 : f32 to vector<8x8xf32>
    %107 = arith.select %105, %106, %103 : vector<8x8xi1>, vector<8x8xf32>
    %cst_42 = arith.constant dense<0xFF800000> : vector<8xf32>
    %108 = vector.multi_reduction <maximumf>, %107, %cst_42 [1] : vector<8x8xf32> to vector<8xf32>
    %109 = vector.shape_cast %108 : vector<8xf32> to vector<8x1xf32>
    %110 = vector.broadcast %109 : vector<8x1xf32> to vector<8x8xf32>
    %111 = arith.subf %107, %110 : vector<8x8xf32>
    %112 = math.exp %111 : vector<8x8xf32>
    %cst_43 = arith.constant dense<0.000000e+00> : vector<8xf32>
    %113 = vector.multi_reduction <add>, %112, %cst_43 [1] : vector<8x8xf32> to vector<8xf32>
    %114 = vector.shape_cast %113 : vector<8xf32> to vector<8x1xf32>
    %115 = tpu.reciprocal %114 {approx = true} : vector<8x1xf32> -> vector<8x1xf32>
    %116 = vector.broadcast %115 : vector<8x1xf32> to vector<8x8xf32>
    %117 = arith.mulf %112, %116 : vector<8x8xf32>
    %118 = arith.truncf %117 : vector<8x8xf32> to vector<8x8xbf16>
    %cst_44 = arith.constant dense<0.000000e+00> : vector<8x8xf32>
    %119 = tpu.matmul %118, %100, %cst_44 {dimension_numbers = #tpu.dot_dimension_numbers<[1], [0], [0], [1], [0, 0, 1, 1], [], []>} : vector<8x8xbf16>, vector<8x8xbf16>, vector<8x8xf32> -> vector<8x8xf32>
    %120 = tpu.concatenate %44, %69, %94, %119 in 1 : vector<8x8xf32>, vector<8x8xf32>, vector<8x8xf32>, vector<8x8xf32> -> vector<8x32xf32>
    %121 = arith.truncf %120 : vector<8x32xf32> to vector<8x32xbf16>
    %c0_45 = arith.constant 0 : index
    %c0_46 = arith.constant 0 : index
    %122 = vector.load %arg8[%c0_45, %c0_46] : memref<32x32xbf16, #tpu.memory_space<vmem>>, vector<32x32xbf16>
    %cst_47 = arith.constant dense<0.000000e+00> : vector<8x32xf32>
    %123 = tpu.matmul %121, %122, %cst_47 {dimension_numbers = #tpu.dot_dimension_numbers<[1], [0], [0], [1], [0, 0, 1, 1], [], []>} : vector<8x32xbf16>, vector<32x32xbf16>, vector<8x32xf32> -> vector<8x32xf32>
    %c0_48 = arith.constant 0 : index
    %c0_49 = arith.constant 0 : index
    %124 = vector.load %arg9[%c0_48, %c0_49] : memref<1x32xf32, #tpu.memory_space<vmem>>, vector<1x32xf32>
    %125 = vector.broadcast %124 : vector<1x32xf32> to vector<8x32xf32>
    %126 = arith.addf %123, %125 : vector<8x32xf32>
    %127 = arith.addf %1, %126 : vector<8x32xf32>
    %cst_50 = arith.constant dense<0.000000e+00> : vector<8xf32>
    %128 = vector.multi_reduction <add>, %127, %cst_50 [1] : vector<8x32xf32> to vector<8xf32>
    %129 = vector.shape_cast %128 : vector<8xf32> to vector<8x1xf32>
    %cst_51 = arith.constant 3.200000e+01 : f32
    %130 = vector.broadcast %cst_51 : f32 to vector<8x1xf32>
    %131 = arith.divf %129, %130 : vector<8x1xf32>
    %132 = vector.broadcast %131 : vector<8x1xf32> to vector<8x32xf32>
    %133 = arith.subf %127, %132 : vector<8x32xf32>
    %134 = arith.mulf %133, %133 : vector<8x32xf32>
    %cst_52 = arith.constant dense<0.000000e+00> : vector<8xf32>
    %135 = vector.multi_reduction <add>, %134, %cst_52 [1] : vector<8x32xf32> to vector<8xf32>
    %136 = vector.shape_cast %135 : vector<8xf32> to vector<8x1xf32>
    %cst_53 = arith.constant 3.200000e+01 : f32
    %137 = vector.broadcast %cst_53 : f32 to vector<8x1xf32>
    %138 = arith.divf %136, %137 : vector<8x1xf32>
    %139 = vector.broadcast %131 : vector<8x1xf32> to vector<8x32xf32>
    %140 = arith.subf %127, %139 : vector<8x32xf32>
    %cst_54 = arith.constant 9.99999974E-6 : f32
    %141 = vector.broadcast %cst_54 : f32 to vector<8x1xf32>
    %142 = arith.addf %138, %141 : vector<8x1xf32>
    %143 = math.rsqrt %142 : vector<8x1xf32>
    %144 = vector.broadcast %143 : vector<8x1xf32> to vector<8x32xf32>
    %145 = arith.mulf %140, %144 : vector<8x32xf32>
    %c0_55 = arith.constant 0 : index
    %c0_56 = arith.constant 0 : index
    %146 = vector.load %arg10[%c0_55, %c0_56] : memref<1x32xf32, #tpu.memory_space<vmem>>, vector<1x32xf32>
    %147 = vector.broadcast %146 : vector<1x32xf32> to vector<8x32xf32>
    %148 = arith.mulf %145, %147 : vector<8x32xf32>
    %c0_57 = arith.constant 0 : index
    %c0_58 = arith.constant 0 : index
    %149 = vector.load %arg11[%c0_57, %c0_58] : memref<1x32xf32, #tpu.memory_space<vmem>>, vector<1x32xf32>
    %150 = vector.broadcast %149 : vector<1x32xf32> to vector<8x32xf32>
    %151 = arith.addf %148, %150 : vector<8x32xf32>
    %c0_59 = arith.constant 0 : index
    %c0_60 = arith.constant 0 : index
    %c0_61 = arith.constant 0 : index
    %152 = vector.load %arg12[%c0_59, %c0_60, %c0_61] : memref<1x8x32xf32, #tpu.memory_space<vmem>>, vector<1x8x32xf32>
    %153 = vector.shape_cast %152 : vector<1x8x32xf32> to vector<8x32xf32>
    %154 = vector.shape_cast %151 : vector<8x32xf32> to vector<1x8x32xf32>
    tpu.vector_store %arg12[%c0_59, %c0_60, %c0_61], %154 {strides = array<i32>} : memref<1x8x32xf32, #tpu.memory_space<vmem>>, vector<1x8x32xf32>,
    return
  }
  func.func @transform_0(%arg0: i32) -> (i32, i32, i32) {
    %c0_i32 = arith.constant 0 : i32
    %c0_i32_0 = arith.constant 0 : i32
    %c0_i32_1 = arith.constant 0 : i32
    return %arg0, %c0_i32, %c0_i32_0 : i32, i32, i32
  }
  func.func @transform_1(%arg0: i32) -> (i32, i32, i32) {
    %c0_i32 = arith.constant 0 : i32
    %c0_i32_0 = arith.constant 0 : i32
    %c0_i32_1 = arith.constant 0 : i32
    return %arg0, %c0_i32, %c0_i32_0 : i32, i32, i32
  }
  func.func @transform_2(%arg0: i32) -> (i32, i32, i32) {
    %c0_i32 = arith.constant 0 : i32
    %c0_i32_0 = arith.constant 0 : i32
    %c0_i32_1 = arith.constant 0 : i32
    return %arg0, %c0_i32, %c0_i32_0 : i32, i32, i32
  }
  func.func @transform_3(%arg0: i32) -> (i32, i32) {
    %c0_i32 = arith.constant 0 : i32
    %c0_i32_0 = arith.constant 0 : i32
    %c0_i32_1 = arith.constant 0 : i32
    return %c0_i32, %c0_i32_0 : i32, i32
  }
  func.func @transform_4(%arg0: i32) -> (i32, i32) {
    %c0_i32 = arith.constant 0 : i32
    %c0_i32_0 = arith.constant 0 : i32
    %c0_i32_1 = arith.constant 0 : i32
    return %c0_i32, %c0_i32_0 : i32, i32
  }
  func.func @transform_5(%arg0: i32) -> (i32, i32) {
    %c0_i32 = arith.constant 0 : i32
    %c0_i32_0 = arith.constant 0 : i32
    %c0_i32_1 = arith.constant 0 : i32
    return %c0_i32, %c0_i32_0 : i32, i32
  }
  func.func @transform_6(%arg0: i32) -> (i32, i32) {
    %c0_i32 = arith.constant 0 : i32
    %c0_i32_0 = arith.constant 0 : i32
    %c0_i32_1 = arith.constant 0 : i32
    return %c0_i32, %c0_i32_0 : i32, i32
  }
  func.func @transform_7(%arg0: i32) -> (i32, i32) {
    %c0_i32 = arith.constant 0 : i32
    %c0_i32_0 = arith.constant 0 : i32
    %c0_i32_1 = arith.constant 0 : i32
    return %c0_i32, %c0_i32_0 : i32, i32
  }
  func.func @transform_8(%arg0: i32) -> (i32, i32) {
    %c0_i32 = arith.constant 0 : i32
    %c0_i32_0 = arith.constant 0 : i32
    %c0_i32_1 = arith.constant 0 : i32
    return %c0_i32, %c0_i32_0 : i32, i32
  }
  func.func @transform_9(%arg0: i32) -> (i32, i32) {
    %c0_i32 = arith.constant 0 : i32
    %c0_i32_0 = arith.constant 0 : i32
    %c0_i32_1 = arith.constant 0 : i32
    return %c0_i32, %c0_i32_0 : i32, i32
  }
  func.func @transform_10(%arg0: i32) -> (i32, i32) {
    %c0_i32 = arith.constant 0 : i32
    %c0_i32_0 = arith.constant 0 : i32
    %c0_i32_1 = arith.constant 0 : i32
    return %c0_i32, %c0_i32_0 : i32, i32
  }
  func.func @transform_11(%arg0: i32) -> (i32, i32, i32) {
    %c0_i32 = arith.constant 0 : i32
    %c0_i32_0 = arith.constant 0 : i32
    %c0_i32_1 = arith.constant 0 : i32
    return %arg0, %c0_i32, %c0_i32_0 : i32, i32, i32
  }
}

module attributes {stable_mosaic.version = 11 : i64} {
  func.func @_ln_kernel(%arg0: i32, %arg1: memref<16x32xf32, #tpu.memory_space<vmem>>, %arg2: memref<1x32xf32, #tpu.memory_space<vmem>>, %arg3: memref<1x32xf32, #tpu.memory_space<vmem>>, %arg4: memref<16x32xf32, #tpu.memory_space<vmem>>) attributes {dimension_semantics = [#tpu.dimension_semantics<parallel>], iteration_bounds = array<i64: 1>, scalar_prefetch = 0 : i64, scratch_operands = 0 : i64, tpu.core_type = #tpu.core_type<tc>, window_params = [{transform_indices = @transform_0, window_bounds = array<i64: 16, 32>}, {pipeline_mode = #tpu.pipeline_mode<synchronous>, transform_indices = @transform_1, window_bounds = array<i64: 1, 32>}, {pipeline_mode = #tpu.pipeline_mode<synchronous>, transform_indices = @transform_2, window_bounds = array<i64: 1, 32>}, {transform_indices = @transform_3, window_bounds = array<i64: 16, 32>}]} {
    %c0 = arith.constant 0 : index
    %c0_0 = arith.constant 0 : index
    %0 = vector.load %arg1[%c0, %c0_0] : memref<16x32xf32, #tpu.memory_space<vmem>>, vector<16x32xf32>
    %cst = arith.constant dense<0.000000e+00> : vector<16xf32>
    %1 = vector.multi_reduction <add>, %0, %cst [1] : vector<16x32xf32> to vector<16xf32>
    %2 = vector.shape_cast %1 : vector<16xf32> to vector<16x1xf32>
    %cst_1 = arith.constant 3.200000e+01 : f32
    %3 = vector.broadcast %cst_1 : f32 to vector<16x1xf32>
    %4 = arith.divf %2, %3 : vector<16x1xf32>
    %5 = vector.broadcast %4 : vector<16x1xf32> to vector<16x32xf32>
    %6 = arith.subf %0, %5 : vector<16x32xf32>
    %7 = arith.mulf %6, %6 : vector<16x32xf32>
    %cst_2 = arith.constant dense<0.000000e+00> : vector<16xf32>
    %8 = vector.multi_reduction <add>, %7, %cst_2 [1] : vector<16x32xf32> to vector<16xf32>
    %9 = vector.shape_cast %8 : vector<16xf32> to vector<16x1xf32>
    %cst_3 = arith.constant 3.200000e+01 : f32
    %10 = vector.broadcast %cst_3 : f32 to vector<16x1xf32>
    %11 = arith.divf %9, %10 : vector<16x1xf32>
    %12 = vector.broadcast %4 : vector<16x1xf32> to vector<16x32xf32>
    %13 = arith.subf %0, %12 : vector<16x32xf32>
    %cst_4 = arith.constant 9.99999974E-6 : f32
    %14 = vector.broadcast %cst_4 : f32 to vector<16x1xf32>
    %15 = arith.addf %11, %14 : vector<16x1xf32>
    %16 = math.rsqrt %15 : vector<16x1xf32>
    %17 = vector.broadcast %16 : vector<16x1xf32> to vector<16x32xf32>
    %18 = arith.mulf %13, %17 : vector<16x32xf32>
    %c0_5 = arith.constant 0 : index
    %c0_6 = arith.constant 0 : index
    %19 = vector.load %arg2[%c0_5, %c0_6] : memref<1x32xf32, #tpu.memory_space<vmem>>, vector<1x32xf32>
    %20 = vector.broadcast %19 : vector<1x32xf32> to vector<16x32xf32>
    %21 = arith.mulf %18, %20 : vector<16x32xf32>
    %c0_7 = arith.constant 0 : index
    %c0_8 = arith.constant 0 : index
    %22 = vector.load %arg3[%c0_7, %c0_8] : memref<1x32xf32, #tpu.memory_space<vmem>>, vector<1x32xf32>
    %23 = vector.broadcast %22 : vector<1x32xf32> to vector<16x32xf32>
    %24 = arith.addf %21, %23 : vector<16x32xf32>
    %c0_9 = arith.constant 0 : index
    %c0_10 = arith.constant 0 : index
    %25 = vector.load %arg4[%c0_9, %c0_10] : memref<16x32xf32, #tpu.memory_space<vmem>>, vector<16x32xf32>
    tpu.vector_store %arg4[%c0_9, %c0_10], %24 {strides = array<i32>} : memref<16x32xf32, #tpu.memory_space<vmem>>, vector<16x32xf32>,
    return
  }
  func.func @transform_0(%arg0: i32) -> (i32, i32) {
    %c0_i32 = arith.constant 0 : i32
    %c0_i32_0 = arith.constant 0 : i32
    return %arg0, %c0_i32 : i32, i32
  }
  func.func @transform_1(%arg0: i32) -> (i32, i32) {
    %c0_i32 = arith.constant 0 : i32
    %c0_i32_0 = arith.constant 0 : i32
    %c0_i32_1 = arith.constant 0 : i32
    return %c0_i32, %c0_i32_0 : i32, i32
  }
  func.func @transform_2(%arg0: i32) -> (i32, i32) {
    %c0_i32 = arith.constant 0 : i32
    %c0_i32_0 = arith.constant 0 : i32
    %c0_i32_1 = arith.constant 0 : i32
    return %c0_i32, %c0_i32_0 : i32, i32
  }
  func.func @transform_3(%arg0: i32) -> (i32, i32) {
    %c0_i32 = arith.constant 0 : i32
    %c0_i32_0 = arith.constant 0 : i32
    return %arg0, %c0_i32 : i32, i32
  }
}

module attributes {stable_mosaic.version = 11 : i64} {
  func.func @_linear_kernel(%arg0: i32, %arg1: i32, %arg2: memref<16x32xf32, #tpu.memory_space<vmem>>, %arg3: memref<32x60xbf16, #tpu.memory_space<vmem>>, %arg4: memref<1x60xf32, #tpu.memory_space<vmem>>, %arg5: memref<16x60xf32, #tpu.memory_space<vmem>>) attributes {dimension_semantics = [#tpu.dimension_semantics<parallel>, #tpu.dimension_semantics<parallel>], iteration_bounds = array<i64: 1, 1>, scalar_prefetch = 0 : i64, scratch_operands = 0 : i64, tpu.core_type = #tpu.core_type<tc>, window_params = [{transform_indices = @transform_0, window_bounds = array<i64: 16, 32>}, {transform_indices = @transform_1, window_bounds = array<i64: 32, 60>}, {transform_indices = @transform_2, window_bounds = array<i64: 1, 60>}, {transform_indices = @transform_3, window_bounds = array<i64: 16, 60>}]} {
    %c0 = arith.constant 0 : index
    %c0_0 = arith.constant 0 : index
    %0 = vector.load %arg2[%c0, %c0_0] : memref<16x32xf32, #tpu.memory_space<vmem>>, vector<16x32xf32>
    %1 = arith.truncf %0 : vector<16x32xf32> to vector<16x32xbf16>
    %c0_1 = arith.constant 0 : index
    %c0_2 = arith.constant 0 : index
    %2 = vector.load %arg3[%c0_1, %c0_2] : memref<32x60xbf16, #tpu.memory_space<vmem>>, vector<32x60xbf16>
    %cst = arith.constant dense<0.000000e+00> : vector<16x60xf32>
    %3 = tpu.matmul %1, %2, %cst {dimension_numbers = #tpu.dot_dimension_numbers<[1], [0], [0], [1], [0, 0, 1, 1], [], []>} : vector<16x32xbf16>, vector<32x60xbf16>, vector<16x60xf32> -> vector<16x60xf32>
    %c0_3 = arith.constant 0 : index
    %c0_4 = arith.constant 0 : index
    %4 = vector.load %arg4[%c0_3, %c0_4] : memref<1x60xf32, #tpu.memory_space<vmem>>, vector<1x60xf32>
    %5 = vector.broadcast %4 : vector<1x60xf32> to vector<16x60xf32>
    %6 = arith.addf %3, %5 : vector<16x60xf32>
    %c0_5 = arith.constant 0 : index
    %c0_6 = arith.constant 0 : index
    %7 = vector.load %arg5[%c0_5, %c0_6] : memref<16x60xf32, #tpu.memory_space<vmem>>, vector<16x60xf32>
    tpu.vector_store %arg5[%c0_5, %c0_6], %6 {strides = array<i32>} : memref<16x60xf32, #tpu.memory_space<vmem>>, vector<16x60xf32>,
    return
  }
  func.func @transform_0(%arg0: i32, %arg1: i32) -> (i32, i32) {
    %c0_i32 = arith.constant 0 : i32
    %c0_i32_0 = arith.constant 0 : i32
    return %arg0, %c0_i32 : i32, i32
  }
  func.func @transform_1(%arg0: i32, %arg1: i32) -> (i32, i32) {
    %c0_i32 = arith.constant 0 : i32
    %c0_i32_0 = arith.constant 0 : i32
    return %c0_i32, %arg1 : i32, i32
  }
  func.func @transform_2(%arg0: i32, %arg1: i32) -> (i32, i32) {
    %c0_i32 = arith.constant 0 : i32
    %c0_i32_0 = arith.constant 0 : i32
    return %c0_i32, %arg1 : i32, i32
  }
  func.func @transform_3(%arg0: i32, %arg1: i32) -> (i32, i32) {
    %c0_i32 = arith.constant 0 : i32
    return %arg0, %arg1 : i32, i32
  }
}

</mosaic_0001>

<bundles_post_ra>
// kernel: transformer_forward.17
= control target key start
LH: loop header
LB: loop body
LE: loop exit
PB: predicated region body
PF: predicated region fallthrough
CT: control target
= control target key end

     0   :  { %vm16_vm0 = vcmask 261120   ;;  %s118_s0 = inlined_call_operand.vmem [shape: f32[16,32], index: 0, kind: input, shape index: {}]   ;;  %s119_s1 = inlined_call_operand.vmem [shape: f32[1,32], index: 1, kind: input, shape index: {}]   ;;  %s120_s2 = inlined_call_operand.vmem [shape: f32[1,32], index: 2, kind: input, shape index: {}]   ;;  %s121_s3 = inlined_call_operand.vmem [shape: f32[16,32], index: 3, kind: output, shape index: {}]  }
   0x1   :  { %v14_v0 = vld [vmem:[%s118_s0] sm:$0xff]  ;;  %v15_v1 = vld [vmem:[%s118_s0 + $0x8] sm:$0xff] }
   0x2   :  { %v17_v2 = vsel %vm16_vm0, %v14_v0, 0.0  ;;  %v20_v3 = vsel %vm16_vm0, %v15_v1, 0.0  ;;  %v68_v21 = vld [vmem:[%s119_s1] ss:$0 sm:$0xff] }
   0x3   :  { %18 = vadd.xlane.f32.xlu0 %v17_v2  ;;  %v69_v23 = vld [vmem:[%s120_s2] ss:$0 sm:$0xff] }
   0x7   :  { %21 = vadd.xlane.f32.xlu0 %v20_v3 }
  0x90   :  { %v19_v4 = vpop.xlane.xlu0 %18 }
  0x91   :  { %v24_v5 = vmul.f32 0.03125, %v19_v4 }
  0x93   :  { %v26_v6 = vsub.f32 %v14_v0, %v24_v5 }
  0x94   :  { %v22_v7 = vpop.xlane.xlu0 %21 }
  0x95   :  { %v25_v8 = vmul.f32 0.03125, %v22_v7  ;;  %v28_v9 = vmul.f32 %v26_v6, %v26_v6 }
  0x97   :  { %v27_v10 = vsub.f32 %v15_v1, %v25_v8  ;;  %v30_v11 = vsel %vm16_vm0, %v28_v9, 0.0 }
  0x98   :  { %31 = vadd.xlane.f32.xlu1 %v30_v11 }
  0x99   :  { %v29_v12 = vmul.f32 %v27_v10, %v27_v10 }
  0x9b   :  { %v33_v13 = vsel %vm16_vm0, %v29_v12, 0.0 }
  0x9c   :  { %34 = vadd.xlane.f32.xlu1 %v33_v13 }
 0x125   :  { %v32_v14 = vpop.xlane.xlu1 %31 }
 0x126   :  { %v36_v15 = vmul.f32 0.03125, %v32_v14 }
 0x128   :  { %v38_v16 = vadd.f32 1e-05, %v36_v15 }
 0x129   :  { %v35_v17 = vpop.xlane.xlu1 %34 }
 0x12a   :  { %70 = vrsqrt.f32 %v38_v16  ;;  %v37_v18 = vmul.f32 0.03125, %v35_v17 }
 0x12c   :  { %v39_v19 = vadd.f32 1e-05, %v37_v18 }
 0x12e   :  { %72 = vrsqrt.f32 %v39_v19 }
 0x134   :  { %v71_v20 = vpop.eup %70 }
 0x135   :  { %v42_v22 = vmul.f32 %v71_v20, %v26_v6 }
 0x137   :  { %v51_v24 = vmul.f32 %v68_v21, %v42_v22 }
 0x138   :  { %v73_v25 = vpop.eup %72 }
 0x139   :  { %v60_v26 = vadd.f32 %v69_v23, %v51_v24  ;;  %v43_v27 = vmul.f32 %v73_v25, %v27_v10 }
 0x13b   :  { %62 = vst.msk [vmem:[%s121_s3] sm:$0xff] %vm16_vm0, %v60_v26  ;;  %v52_v28 = vmul.f32 %v68_v21, %v43_v27 }
 0x13d   :  { %v61_v29 = vadd.f32 %v69_v23, %v52_v28 }
 0x13f   :  { %63 = vst.msk [vmem:[%s121_s3 + $0x8] sm:$0xff] %vm16_vm0, %v61_v29 }

// kernel: transformer_forward.25
= control target key start
LH: loop header
LB: loop body
LE: loop exit
PB: predicated region body
PF: predicated region fallthrough
CT: control target
= control target key end

     0   :  { %v152_v1 = vmov 0.0   ;;  %vm153_vm0 = vmmov 0   ;;  %s204_s0 = inlined_call_operand.vmem [shape: f32[16,32], index: 0, kind: input, shape index: {}]   ;;  %s205_s1 = inlined_call_operand.vmem [shape: bf16[32,60], index: 1, kind: input, shape index: {}]   ;;  %s206_s2 = inlined_call_operand.vmem [shape: f32[1,60], index: 2, kind: input, shape index: {}]   ;;  %s207_s3 = inlined_call_operand.hbm [shape: f32[16,60], index: 3, kind: output, shape index: {}]  }
   0x1   :  { %v126_v0 = vld [vmem:[%s205_s1] sm:$0xff]   ;;  %113 = vmatprep.subr.bf16.mxu0 %v152_v1  ;;  %v127_v2 = vld [vmem:[%s205_s1 + $0x8] sm:$0xff]   ;;  %117 = vmatprep.mubr.msk.bf16.mxu0 %vm153_vm0, %v152_v1 }
   0x2   :  { %114 = vmatpush3.bf16.msra.mxu0 %v126_v0  ;;  %v16_v3 = vld [vmem:[%s204_s0] sm:$0xff]  ;;  %v17_v4 = vld [vmem:[%s204_s0 + $0x8] sm:$0xff] }
   0x3   :  { %115 = vmatprep.subr.bf16.mxu0 %v152_v1 }
   0x4   :  { %8 = vsyncpa [#allocation3], 0  ;;  %v18_v5 = vpack.c.bf16 %v17_v4, %v16_v3  ;;  %vm42_vm1 = vcmask 261120   ;;  %v106_v6 = vld [vmem:[%s206_s2] ss:$0 sm:$0xff]  ;;  %s154_s1 = smov [#allocation2]  }
   0x5   :  { %s95_s22 = sshll.u32 %s154_s1, 4  ;;  %vm87_vm2 = vcmask 490496   ;;  %s96_s22 = int_to_ptr.vmem [resolvable:$true] %s95_s22 }
   0x6   :  { %116 = vmatpush3.bf16.msra.mxu0 %v127_v2  ;;  %s128_s0 = scalar_lea.vmem %s96_s22, 256  ;;  %p133_p1 = scmp.lt.s32.totalorder %s96_s22, %s96_s22 }
   0x7   :  { %p129_p0 = scmp.ne.s32.totalorder %s96_s22, %s128_s0  ;;  %p134_p2 = scmp.lt.s32.totalorder %s128_s0, %s128_s0 }
   0x9   :  { %118 = vmatmul.mubr.msk.bf16.vlgmr.msra.gmra.mrb[0].mxu0 %vm42_vm1, %v18_v5  ;;  %p135_p3 = por %p134_p2, %p133_p1 }
   0xb   :  { %p136_p4 = pnand %p135_p3, %p129_p0 }
  0xdc   :  { %v80_v7 = vpop.f32.mrb[0].mxu0 }
  0xdd   :  { %v81_v8 = vadd.f32 %v106_v6, %v80_v7  ;;  %v119_v9 = vpop.f32.mrb[1].mxu0 }
  0xde   :  { %v83_v10 = vpop.f32.mrb[2].mxu0 }
  0xdf   :  { %88 = vst.msk [vmem:[#allocation2] sm:$0xff] %vm87_vm2, %v81_v8  ;;  %v84_v11 = vadd.f32 %v106_v6, %v83_v10  ;;  %v120_v12 = vpop.f32.mrb[3].mxu0 }
  0xe1   :  { %89 = vst.msk [vmem:[#allocation2 + $0x8] sm:$0xff] %vm87_vm2, %v84_v11 }
  0xe2   :  { %139 = shalt.err (!%p136_p4)
}
  0xe3   :  { %s140_s24 = scalar_lea.hbm %s207_s3, 256 }
  0xe4   :  { %p141_p5 = scmp.ne.s32.totalorder %s207_s3, %s140_s24  ;;  %p144_p6 = scmp.lt.u32.totalorder %s140_s24, %s207_s3 }
  0xe6   :  { %p146_p7 = pnand %p144_p6, %p141_p5 }
  0xe8   :  { %149 = shalt.err (!%p146_p7)
}
  0xe9   :  { %s155_s29 = smov 128   ;;  %s156_s30 = smov 8  }
  0xea   :  { %101 = dma.vmem_to_hbm [thread:$0]  %s96_s22, 256, %s207_s3, [#allocation3], %s155_s29, %s155_s29, %s156_s30  }
  0xeb   :  { %150 = dma.done.wait [#allocation3], 256  }
  0xec   :  { %151 = vsyncadd [#allocation3], 4294967040 }
  0xed   :  { %105 = vsyncpa [#allocation3], 1 }

// kernel: transformer_forward.14
= control target key start
LH: loop header
LB: loop body
LE: loop exit
PB: predicated region body
PF: predicated region fallthrough
CT: control target
= control target key end

     0   :  { %v290_v0 = vmov 0.0   ;;  %vm291_vm0 = vmmov 0   ;;  %vm53_vm1 = vcmask 261120   ;;  %vm140_vm2 = vcmask 523264   ;;  %s381_s1 = inlined_call_operand.vmem [shape: bf16[32,64], index: 1, kind: input, shape index: {}]   ;;  %s382_s0 = inlined_call_operand.vmem [shape: f32[16,32], index: 0, kind: input, shape index: {}]   ;;  %s383_s3 = inlined_call_operand.vmem [shape: bf16[64,32], index: 3, kind: input, shape index: {}]   ;;  %s384_s2 = inlined_call_operand.vmem [shape: f32[1,64], index: 2, kind: input, shape index: {}]   ;;  %s385_s4 = inlined_call_operand.vmem [shape: f32[1,32], index: 4, kind: input, shape index: {}]   ;;  %s386_s5 = inlined_call_operand.vmem [shape: f32[1,32], index: 5, kind: input, shape index: {}]   ;;  %s387_s6 = inlined_call_operand.vmem [shape: f32[1,32], index: 6, kind: input, shape index: {}]   ;;  %s388_s7 = inlined_call_operand.vmem [shape: f32[16,32], index: 7, kind: output, shape index: {}]  }
   0x1   :  { %258 = vmatprep.subr.bf16.mxu0 %v290_v0  ;;  %v280_v1 = vld [vmem:[%s381_s1] sm:$0xff]   ;;  %262 = vmatprep.mubr.msk.bf16.mxu0 %vm291_vm0, %v290_v0  ;;  %v281_v2 = vld [vmem:[%s381_s1 + $0x8] sm:$0xff]   ;;  %v284_v8 = vld [vmem:[%s383_s3 + $0x10] sm:$0xff]  }
   0x2   :  { %266 = vmatprep.subr.bf16.mxu1 %v290_v0  ;;  %274 = vmatprep.mubr.msk.bf16.mxu1 %vm291_vm0, %v290_v0  ;;  %v27_v3 = vld [vmem:[%s382_s0] sm:$0xff]  ;;  %v28_v4 = vld [vmem:[%s382_s0 + $0x8] sm:$0xff]  ;;  %v285_v9 = vld [vmem:[%s383_s3 + $0x18] sm:$0xff]  }
   0x3   :  { %259 = vmatpush3.bf16.msra.mxu0 %v280_v1  ;;  %v282_v5 = vld [vmem:[%s383_s3] sm:$0xff]   ;;  %v283_v6 = vld [vmem:[%s383_s3 + $0x8] sm:$0xff]   ;;  %v29_v7 = vpack.c.bf16 %v28_v4, %v27_v3 }
   0x4   :  { %260 = vmatprep.subr.bf16.mxu0 %v290_v0  ;;  %267 = vmatpush3.bf16.msra.mxu1 %v282_v5  ;;  %v238_v10 = vld [vmem:[%s384_s2] ss:$0 sm:$0xff] }
   0x5   :  { %268 = vmatprep.subr.bf16.mxu1 %v290_v0  ;;  %v242_v20 = vld [vmem:[%s385_s4] ss:$0 sm:$0xff] }
   0x6   :  { %v248_v48 = vld [vmem:[%s386_s5] ss:$0 sm:$0xff] }
   0x7   :  { %261 = vmatpush3.bf16.msra.mxu0 %v281_v2  ;;  %v249_v50 = vld [vmem:[%s387_s6] ss:$0 sm:$0xff] }
   0x8   :  { %269 = vmatpush3.bf16.msra.mxu1 %v283_v6 }
   0x9   :  { %270 = vmatprep.subr.bf16.mxu1 %v290_v0 }
   0xa   :  { %263 = vmatmul.mubr.msk.bf16.vlgmr.msra.gmra.mrb[0].mxu0 %vm53_vm1, %v29_v7 }
   0xc   :  { %271 = vmatpush3.bf16.msra.mxu1 %v284_v8 }
   0xd   :  { %272 = vmatprep.subr.bf16.mxu1 %v290_v0 }
  0x10   :  { %273 = vmatpush3.bf16.msra.mxu1 %v285_v9 }
  0xdd   :  { %v91_v11 = vpop.f32.mrb[0].mxu0 }
  0xde   :  { %v92_v12 = vadd.f32 %v238_v10, %v91_v11  ;;  %v264_v13 = vpop.f32.mrb[1].mxu0 }
  0xdf   :  { %v94_v14 = vpop.f32.mrb[2].mxu0 }
  0xe0   :  { %v95_v15 = vadd.f32 %v238_v10, %v94_v14  ;;  %v265_v16 = vpop.f32.mrb[3].mxu0  ;;  %v98_v17 = vmax.f32 %v92_v12, 0.0 }
  0xe2   :  { %v99_v18 = vmax.f32 %v95_v15, 0.0 }
  0xe4   :  { %v100_v19 = vpack.c.bf16 %v99_v18, %v98_v17 }
  0xe6   :  { %275 = vmatmul.mubr.msk.bf16.vlgmr.msra.gmra.mrb[0].mxu1 %vm140_vm2, %v100_v19 }
 0x1b9   :  { %v178_v21 = vpop.f32.mrb[0].mxu1 }
 0x1ba   :  { %v179_v22 = vadd.f32 %v242_v20, %v178_v21  ;;  %v276_v23 = vpop.f32.mrb[1].mxu1 }
 0x1bb   :  { %v181_v24 = vpop.f32.mrb[2].mxu1 }
 0x1bc   :  { %v182_v25 = vadd.f32 %v242_v20, %v181_v24  ;;  %v277_v26 = vpop.f32.mrb[3].mxu1  ;;  %v185_v27 = vadd.f32 %v179_v22, %v27_v3 }
 0x1be   :  { %v187_v28 = vsel %vm53_vm1, %v185_v27, 0.0  ;;  %v186_v29 = vadd.f32 %v182_v25, %v28_v4 }
 0x1bf   :  { %188 = vadd.xlane.f32.xlu0 %v187_v28 }
 0x1c0   :  { %v190_v30 = vsel %vm53_vm1, %v186_v29, 0.0 }
 0x1c3   :  { %191 = vadd.xlane.f32.xlu0 %v190_v30 }
 0x24c   :  { %v189_v31 = vpop.xlane.xlu0 %188 }
 0x24d   :  { %v194_v32 = vmul.f32 0.03125, %v189_v31 }
 0x24f   :  { %v196_v33 = vsub.f32 %v185_v27, %v194_v32 }
 0x250   :  { %v192_v34 = vpop.xlane.xlu0 %191 }
 0x251   :  { %v195_v35 = vmul.f32 0.03125, %v192_v34  ;;  %v198_v36 = vmul.f32 %v196_v33, %v196_v33 }
 0x253   :  { %v197_v37 = vsub.f32 %v186_v29, %v195_v35  ;;  %v200_v38 = vsel %vm53_vm1, %v198_v36, 0.0 }
 0x254   :  { %201 = vadd.xlane.f32.xlu1 %v200_v38 }
 0x255   :  { %v199_v39 = vmul.f32 %v197_v37, %v197_v37 }
 0x257   :  { %v203_v40 = vsel %vm53_vm1, %v199_v39, 0.0 }
 0x258   :  { %204 = vadd.xlane.f32.xlu1 %v203_v40 }
 0x2e1   :  { %v202_v41 = vpop.xlane.xlu1 %201 }
 0x2e2   :  { %v206_v42 = vmul.f32 0.03125, %v202_v41 }
 0x2e4   :  { %v208_v43 = vadd.f32 1e-05, %v206_v42 }
 0x2e5   :  { %v205_v44 = vpop.xlane.xlu1 %204 }
 0x2e6   :  { %286 = vrsqrt.f32 %v208_v43  ;;  %v207_v45 = vmul.f32 0.03125, %v205_v44 }
 0x2e8   :  { %v209_v46 = vadd.f32 1e-05, %v207_v45 }
 0x2ea   :  { %288 = vrsqrt.f32 %v209_v46 }
 0x2f0   :  { %v287_v47 = vpop.eup %286 }
 0x2f1   :  { %v212_v49 = vmul.f32 %v287_v47, %v196_v33 }
 0x2f3   :  { %v221_v51 = vmul.f32 %v248_v48, %v212_v49 }
 0x2f4   :  { %v289_v52 = vpop.eup %288 }
 0x2f5   :  { %v230_v53 = vadd.f32 %v249_v50, %v221_v51  ;;  %v213_v54 = vmul.f32 %v289_v52, %v197_v37 }
 0x2f7   :  { %232 = vst.msk [vmem:[%s388_s7] sm:$0xff] %vm53_vm1, %v230_v53  ;;  %v222_v55 = vmul.f32 %v248_v48, %v213_v54 }
 0x2f9   :  { %v231_v56 = vadd.f32 %v249_v50, %v222_v55 }
 0x2fb   :  { %233 = vst.msk [vmem:[%s388_s7 + $0x8] sm:$0xff] %vm53_vm1, %v231_v56 }

// kernel: transformer_forward.13
= control target key start
LH: loop header
LB: loop body
LE: loop exit
PB: predicated region body
PF: predicated region fallthrough
CT: control target
= control target key end

     0   :  { %s1453_s17 = smov 0   ;;  %s1601_s0 = inlined_call_operand.vmem [shape: f32[2,8,32], index: 0, kind: input, shape index: {}, may-alias: {0,1}]   ;;  %s1602_s1 = inlined_call_operand.vmem [shape: f32[2,8,32], index: 1, kind: input, shape index: {}, may-alias: {0,1}]   ;;  %s1603_s2 = inlined_call_operand.vmem [shape: f32[2,8,8], index: 2, kind: input, shape index: {}]   ;;  %s1604_s3 = inlined_call_operand.vmem [shape: bf16[32,32], index: 3, kind: input, shape index: {}]   ;;  %s1605_s4 = inlined_call_operand.vmem [shape: f32[1,32], index: 4, kind: input, shape index: {}]   ;;  %s1606_s5 = inlined_call_operand.vmem [shape: bf16[32,64], index: 5, kind: input, shape index: {}]   ;;  %s1607_s6 = inlined_call_operand.vmem [shape: f32[1,64], index: 6, kind: input, shape index: {}]   ;;  %s1608_s7 = inlined_call_operand.vmem [shape: bf16[32,32], index: 7, kind: input, shape index: {}]   ;;  %s1609_s8 = inlined_call_operand.vmem [shape: f32[1,32], index: 8, kind: input, shape index: {}]   ;;  %s1610_s9 = inlined_call_operand.vmem [shape: f32[1,32], index: 9, kind: input, shape index: {}]   ;;  %s1611_s10 = inlined_call_operand.vmem [shape: f32[1,32], index: 10, kind: input, shape index: {}]   ;;  %s1612_s11 = inlined_call_operand.vmem [shape: f32[2,8,32], index: 11, kind: output, shape index: {}]  }
   0x1 LB: > { %s1199_s18 = sadd.s32 4294967295, %s1379_s17   ;;  %p1203_p0 = scmp.ge.s32.totalorder %s1379_s17, 1  ;;  %s1379_s17 = sphi %s1453_s17, %s21_s17  }
   0x2   : > { %p354_p1 = scmp.lt.s32.totalorder %s1379_s17, 3 }
   0x4   : > { %p355_p2 = pnand %p1203_p0, %p354_p1 }
   0x5   : > { %v1349_v0 = vld [vmem:[%s1606_s5] sm:$0xff] (!%p355_p2)   ;;  %v1381_v1 = vmov (!%p355_p2), 0.0   ;;  %v1351_v3 = vld [vmem:[%s1606_s5 + $0x8] sm:$0xff] (!%p355_p2)   ;;  %vm1382_vm0 = vmmov (!%p355_p2), 0   ;;  %p400_p3 = scmp.lt.s32.totalorder (!%p355_p2), %s1199_s18, 1  ;;  %vm445_vm1 = vcmask (!%p355_p2), 261120  }
   0x6   : > { %358 = sbr.rel (%p355_p2) target bundleno = 1774 (0x6ee), region = 64  ;;  %1265 = vmatprep.subr.bf16.mxu1 (!%p355_p2), %v1381_v1  ;;  %1257 = vmatprep.subr.bf16.mxu0 (!%p355_p2), %v1381_v1  ;;  %v1350_v2 = vld [vmem:[%s1604_s3] sm:$0xff] (!%p355_p2)   ;;  %v1352_v4 = vld [vmem:[%s1604_s3 + $0x8] sm:$0xff] (!%p355_p2)   ;;  %vm557_vm2 = vcmask (!%p355_p2), 64512   ;;  %s1383_s20 = smov (!%p355_p2), 112   ;;  %vm625_vm4 = vcmask (!%p355_p2), 1043456  }
   0x7   : > { %1266 = vmatpush3.bf16.msra.mxu1 (!%p355_p2), %v1349_v0  ;;  %1269 = vmatprep.mubr.msk.bf16.mxu1 (!%p355_p2), %vm1382_vm0, %v1381_v1  ;;  %v1212_v9 = vld [vmem:[%s1607_s6] ss:$0 sm:$0xff] (!%p355_p2)  ;;  %s1384_s21 = smov (!%p355_p2), 120   ;;  %s1385_s22 = smov (!%p355_p2), 104   ;;  %vm1019_vm5 = vcmask (!%p355_p2), 130048   ;;  %vm1021_vm6 = vcmask (!%p355_p2), 195584  }
   0x8   : > { %1267 = vmatprep.subr.bf16.mxu1 (!%p355_p2), %v1381_v1  ;;  %1258 = vmatpush3.bf16.msra.mxu0 (!%p355_p2), %v1350_v2  ;;  %v1208_v10 = vld [vmem:[%s1605_s4] ss:$0 sm:$0xff] (!%p355_p2)  ;;  %s1386_s26 = smov (!%p355_p2), 96   ;;  %s1387_s28 = smov (!%p355_p2), 80  }
   0x9   : > { %1259 = vmatprep.subr.bf16.mxu0 (!%p355_p2), %v1381_v1  ;;  %1261 = vmatprep.mubr.msk.bf16.mxu0 (!%p355_p2), %vm1382_vm0, %v1381_v1  ;;  %s1388_s29 = smov (!%p355_p2), 72   ;;  %s1392_s19 = smov (!%p355_p2), 24  }
   0xb   : > { %1268 = vmatpush3.bf16.msra.mxu1 (!%p355_p2), %v1351_v3 }
   0xc   : > { %1260 = vmatpush3.bf16.msra.mxu0 (!%p355_p2), %v1352_v4  ;;  %1279 = vmatprep.subr.bf16.mxu1 (!%p355_p2), %v1381_v1 }
   0xd   : > { %s1614_s18 = smov (!%p400_p3, %s1199_s18), 1  ;;  %1273 = vmatprep.subr.bf16.mxu0 %v1381_v1 }
   0xe   : > { %s1481_s27 = sshll.u32 %s1614_s18, 3  ;;  %s1391_s18 = smov 16  }
   0xf   : > { %s407_s30 = scalar_lea.vmem %s1602_s1, %s1481_s27  ;;  %s403_s14 = scalar_lea.vmem %s1601_s0, %s1481_s27 }
  0x10   : > { %v418_v5 = vld [vmem:[%s407_s30] sm:$0xff]  ;;  %s411_s25 = scalar_lea.vmem %s1603_s2, %s1481_s27  ;;  %s1389_s30 = smov 88  }
  0x11   : > { %v421_v6 = vpack.c.bf16 %v418_v5, %v418_v5  ;;  %v1493_v7 = vld [vmem:[%s403_s14] sm:$0xff]  ;;  %s1390_s14 = smov 8  }
  0x12   : > { %v420_v8 = vpack.c.bf16 %v1493_v7, %v1493_v7  ;;  %v419_v33 = vld [vmem:[%s411_s25] sm:$0xff] }
  0x13   : > { %1270 = vmatmul.mubr.msk.bf16.vlgmr.msra.gmra.mrb[0].mxu1 %vm445_vm1, %v421_v6  ;;  %vm605_vm3 = vcmp.eq.f32.partialorder %v419_v33, 0.0 }
  0x14   : > { %1262 = vmatmul.mubr.msk.bf16.vlgmr.msra.gmra.mrb[0].mxu0 %vm445_vm1, %v420_v8  ;;  %1281 = vmatprep.mubr.msk.bf16.mxu1 %vm1382_vm0, %v1381_v1 }
  0x15   : > { %1275 = vmatprep.mubr.msk.bf16.mxu0 %vm1382_vm0, %v1381_v1 }
  0xe6   : > { %v549_v11 = vpop.f32.mrb[0].mxu1 }
  0xe7   : > { %v550_v12 = vadd.f32 %v1212_v9, %v549_v11  ;;  %v1271_v13 = vpop.f32.mrb[1].mxu1  ;;  %v483_v14 = vpop.f32.mrb[0].mxu0 }
  0xe8   : > { %v552_v15 = vpop.f32.mrb[2].mxu1  ;;  %v484_v16 = vadd.f32 %v1208_v10, %v483_v14  ;;  %v1263_v17 = vpop.f32.mrb[1].mxu0 }
  0xe9   : > { %v1509_v18 = vpack.c.bf16 %v550_v12, %v550_v12  ;;  %v1272_v19 = vpop.f32.mrb[3].mxu1  ;;  %v486_v20 = vpop.f32.mrb[2].mxu0 }
  0xea   : > { %v1264_v21 = vpop.f32.mrb[3].mxu0  ;;  %v555_v22 = vpack.c.bf16 %v484_v16, %v484_v16 }
  0xeb   : > { %784 = vrot.lane.b32.xlu1 %v1509_v18, %s1383_s20  ;;  %672 = vrot.lane.b32.xlu0 %v1509_v18, %s1384_s21  ;;  %v562_v23 = vsel %vm557_vm2, %v1509_v18, 0 }
  0xec   : > { %1274 = vmatpush3.bf16.xpose.msra.mxu0 %v562_v23 }
  0xed   : > { %1285 = vmatprep.subr.bf16.mxu0 %v1381_v1 }
  0xef   : > { %782 = vrot.lane.b32.xlu1 %v555_v22, %s1383_s20  ;;  %670 = vrot.lane.b32.xlu0 %v555_v22, %s1384_s21 }
  0xf3   : > { %894 = vrot.lane.b32.xlu1 %v555_v22, %s1385_s22  ;;  %896 = vrot.lane.b32.xlu0 %v1509_v18, %s1385_s22 }
  0xf4   : > { %1276 = vmatmul.mubr.msk.bf16.vlgmr.msra.gmra.mrb[4].mxu0 %vm557_vm2, %v555_v22 }
  0xf5   : > { %1287 = vmatprep.mubr.msk.bf16.mxu0 %vm1382_vm0, %v1381_v1 }
 0x15d   : > { %v673_v24 = vpop.permute.xlu0 %672  ;;  %v785_v26 = vpop.permute.xlu1 %784 }
 0x15e   : > { %v678_v25 = vsel %vm557_vm2, %v673_v24, 0  ;;  %v790_v28 = vsel %vm557_vm2, %v785_v26, 0 }
 0x15f   : > { %1286 = vmatpush3.bf16.xpose.msra.mxu0 %v678_v25 }
 0x160   : > { %1297 = vmatprep.subr.bf16.mxu0 %v1381_v1 }
 0x161   : > { %v671_v27 = vpop.permute.xlu0 %670  ;;  %v783_v30 = vpop.permute.xlu1 %782 }
 0x165   : > { %v897_v29 = vpop.permute.xlu0 %896  ;;  %v895_v32 = vpop.permute.xlu1 %894 }
 0x166   : > { %1288 = vmatmul.mubr.msk.bf16.vlgmr.msra.gmra.mrb[8].mxu0 %vm557_vm2, %v671_v27  ;;  %v902_v31 = vsel %vm557_vm2, %v897_v29, 0 }
 0x167   : > { %1298 = vmatpush3.bf16.xpose.msra.mxu0 %v790_v28  ;;  %1299 = vmatprep.mubr.msk.bf16.mxu0 %vm1382_vm0, %v1381_v1 }
 0x168   : > { %1309 = vmatprep.subr.bf16.mxu0 %v1381_v1 }
 0x16e   : > { %1300 = vmatmul.mubr.msk.bf16.vlgmr.msra.gmra.mrb[12].mxu0 %vm557_vm2, %v783_v30 }
 0x16f   : > { %1310 = vmatpush3.bf16.xpose.msra.mxu0 %v902_v31  ;;  %1311 = vmatprep.mubr.msk.bf16.mxu0 %vm1382_vm0, %v1381_v1 }
 0x170   : > { %1321 = vmatprep.subr.bf16.mxu0 %v1381_v1 }
 0x176   : > { %1312 = vmatmul.mubr.msk.bf16.vlgmr.msra.gmra.mrb[16].mxu0 %vm557_vm2, %v895_v32 }
 0x177   : > { %1325 = vmatprep.mubr.msk.bf16.mxu0 %vm1382_vm0, %v1381_v1 }
 0x1c7   : > { %v598_v34 = vpop.f32.mrb[4].mxu0 }
 0x1c8   : > { %v604_v35 = vmul.f32 0.35355338, %v598_v34  ;;  %v1277_v36 = vpop.f32.mrb[5].mxu0 }
 0x1c9   : > { %v601_v37 = vpop.f32.mrb[6].mxu0 }
 0x1ca   : > { %v1278_v38 = vpop.f32.mrb[7].mxu0  ;;  %v606_v39 = vsel %vm605_vm3, -1e+09, %v604_v35 }
 0x1cb   : > { %v607_v40 = vsel %vm557_vm2, %v606_v39, -inf }
 0x1cc   : > { %608 = vmax.xlane.f32.xlu0 %v607_v40 }
 0x239   : > { %v714_v41 = vpop.f32.mrb[8].mxu0 }
 0x23a   : > { %v720_v42 = vmul.f32 0.35355338, %v714_v41  ;;  %v1289_v43 = vpop.f32.mrb[9].mxu0 }
 0x23b   : > { %v717_v44 = vpop.f32.mrb[10].mxu0 }
 0x23c   : > { %v1290_v45 = vpop.f32.mrb[11].mxu0  ;;  %v721_v46 = vsel %vm605_vm3, -1e+09, %v720_v42 }
 0x23d   : > { %v722_v47 = vsel %vm557_vm2, %v721_v46, -inf }
 0x23e   : > { %723 = vmax.xlane.f32.xlu1 %v722_v47 }
 0x241   : > { %v826_v48 = vpop.f32.mrb[12].mxu0 }
 0x242   : > { %v832_v49 = vmul.f32 0.35355338, %v826_v48  ;;  %v1301_v50 = vpop.f32.mrb[13].mxu0  ;;  %v1353_v48 = vld [vmem:[%s1608_s7] sm:$0xff]  }
 0x243   : > { %v829_v51 = vpop.f32.mrb[14].mxu0  ;;  %1322 = vmatpush3.bf16.msra.mxu0 %v1353_v48 }
 0x244   : > { %v1302_v52 = vpop.f32.mrb[15].mxu0  ;;  %v833_v53 = vsel %vm605_vm3, -1e+09, %v832_v49  ;;  %1323 = vmatprep.subr.bf16.mxu0 %v1381_v1 }
 0x245   : > { %v834_v54 = vsel %vm557_vm2, %v833_v53, -inf }
 0x246   : > { %835 = vmax.xlane.f32.xlu0 %v834_v54 }
 0x249   : > { %v938_v55 = vpop.f32.mrb[16].mxu0 }
 0x24a   : > { %v944_v56 = vmul.f32 0.35355338, %v938_v55  ;;  %v1313_v57 = vpop.f32.mrb[17].mxu0 }
 0x24b   : > { %v941_v58 = vpop.f32.mrb[18].mxu0 }
 0x24c   : > { %v1314_v59 = vpop.f32.mrb[19].mxu0  ;;  %v945_v60 = vsel %vm605_vm3, -1e+09, %v944_v56 }
 0x24d   : > { %v946_v61 = vsel %vm557_vm2, %v945_v60, -inf }
 0x24e   : > { %947 = vmax.xlane.f32.xlu0 %v946_v61 }
 0x259   : > { %v609_v62 = vpop.xlane.xlu0 %608 }
 0x25a   : > { %v610_v63 = vsub.f32 %v606_v39, %v609_v62 }
 0x25c   : > { %v611_v0 = vmul.f32 1.442695, %v610_v63 }
 0x25e   : > { %1355 = vpow2.f32 %v611_v0 }
 0x268   : > { %v1356_v2 = vpop.eup %1355 }
 0x269   : > { %v613_v3 = vsel %vm557_vm2, %v1356_v2, 0.0 }
 0x26a   : > { %614 = vadd.xlane.f32.xlu1 %v613_v3 }
 0x27b   : > { %620 = vrot.lane.b32.xlu1 %v1509_v18, %s1386_s26 }
 0x2cb   : > { %v724_v4 = vpop.xlane.xlu1 %723 }
 0x2cc   : > { %v725_v5 = vsub.f32 %v721_v46, %v724_v4 }
 0x2ce   : > { %v726_v6 = vmul.f32 1.442695, %v725_v5  ;;  %v1224_v5 = vld [vmem:[%s1609_s8] ss:$0 sm:$0xff] }
 0x2d0   : > { %1357 = vpow2.f32 %v726_v6 }
 0x2d3   : > { %v836_v8 = vpop.xlane.xlu0 %835 }
 0x2d4   : > { %v837_v9 = vsub.f32 %v833_v53, %v836_v8  ;;  %v1354_v53 = vld [vmem:[%s1608_s7 + $0x8] sm:$0xff]  }
 0x2d5   : > { %1324 = vmatpush3.bf16.msra.mxu0 %v1354_v53 }
 0x2d6   : > { %v838_v10 = vmul.f32 1.442695, %v837_v9 }
 0x2d8   : > { %1359 = vpow2.f32 %v838_v10 }
 0x2da   : > { %v1358_v11 = vpop.eup %1357 }
 0x2db   : > { %v948_v12 = vpop.xlane.xlu0 %947  ;;  %v728_v13 = vsel %vm557_vm2, %v1358_v11, 0.0 }
 0x2dc   : > { %v949_v14 = vsub.f32 %v945_v60, %v948_v12  ;;  %729 = vadd.xlane.f32.xlu0 %v728_v13 }
 0x2de   : > { %v950_v15 = vmul.f32 1.442695, %v949_v14 }
 0x2e0   : > { %1361 = vpow2.f32 %v950_v15 }
 0x2e2   : > { %v1360_v16 = vpop.eup %1359 }
 0x2e3   : > { %v840_v17 = vsel %vm557_vm2, %v1360_v16, 0.0 }
 0x2e4   : > { %841 = vadd.xlane.f32.xlu1 %v840_v17 }
 0x2ea   : > { %v1362_v19 = vpop.eup %1361 }
 0x2eb   : > { %v952_v20 = vsel %vm557_vm2, %v1362_v19, 0.0 }
 0x2ec   : > { %953 = vadd.xlane.f32.xlu0 %v952_v20 }
 0x2f5   : > { %846 = vrot.lane.b32.xlu1 %v1509_v18, %s1387_s28 }
 0x2f7   : > { %v615_v21 = vpop.xlane.xlu1 %614 }
 0x2f8   : > { %1363 = vrcp.f32 %v615_v21 }
 0x2f9   : > { %958 = vrot.lane.b32.xlu1 %v1509_v18, %s1388_s29  ;;  %s415_s29 = scalar_lea.vmem %s1612_s11, %s1481_s27 }
 0x2fb   : > { %v621_v22 = vpop.permute.xlu1 %620 }
 0x2fc   : > { %v627_v23 = vsel %vm625_vm4, %v621_v22, 0 }
 0x2fd   : > { %1280 = vmatpush3.bf16.msra.mxu1 %v627_v23 }
 0x2fe   : > { %1291 = vmatprep.subr.bf16.mxu1 %v1381_v1 }
 0x302   : > { %v1364_v24 = vpop.eup %1363  ;;  %734 = vrot.lane.b32.xlu0 %v1509_v18, %s1389_s30 }
 0x303   : > { %v617_v25 = vmul.f32 %v1364_v24, %v1356_v2 }
 0x305   : > { %v618_v26 = vpack.c.bf16 %v617_v25, %v617_v25  ;;  %v1229_v25 = vld [vmem:[%s1611_s10] ss:$0 sm:$0xff] }
 0x307   : > { %1282 = vmatmul.mubr.msk.bf16.vlgmr.msra.gmra.mrb[4].mxu1 %vm557_vm2, %v618_v26 }
 0x308   : > { %1293 = vmatprep.mubr.msk.bf16.mxu1 %vm1382_vm0, %v1381_v1 }
 0x369   : > { %v730_v27 = vpop.xlane.xlu0 %729 }
 0x36a   : > { %1365 = vrcp.f32 %v730_v27 }
 0x371   : > { %v842_v28 = vpop.xlane.xlu1 %841 }
 0x372   : > { %1367 = vrcp.f32 %v842_v28 }
 0x374   : > { %v1366_v29 = vpop.eup %1365 }
 0x375   : > { %v732_v31 = vmul.f32 %v1366_v29, %v1358_v11  ;;  %v847_v34 = vpop.permute.xlu1 %846 }
 0x376   : > { %v852_v36 = vsel %vm625_vm4, %v847_v34, 0 }
 0x377   : > { %v733_v18 = vpack.c.bf16 %v732_v31, %v732_v31 }
 0x379   : > { %v954_v30 = vpop.xlane.xlu0 %953  ;;  %v959_v38 = vpop.permute.xlu1 %958 }
 0x37a   : > { %1369 = vrcp.f32 %v954_v30  ;;  %v964_v41 = vsel %vm625_vm4, %v959_v38, 0 }
 0x37c   : > { %v1368_v35 = vpop.eup %1367 }
 0x37d   : > { %v735_v32 = vpop.permute.xlu0 %734  ;;  %v844_v37 = vmul.f32 %v1368_v35, %v1360_v16 }
 0x37e   : > { %v740_v33 = vsel %vm625_vm4, %v735_v32, 0 }
 0x37f   : > { %1292 = vmatpush3.bf16.msra.mxu1 %v740_v33  ;;  %v845_v39 = vpack.c.bf16 %v844_v37, %v844_v37 }
 0x380   : > { %1303 = vmatprep.subr.bf16.mxu1 %v1381_v1 }
 0x382   : > { %1294 = vmatmul.mubr.msk.bf16.vlgmr.msra.gmra.mrb[8].mxu1 %vm557_vm2, %v733_v18 }
 0x383   : > { %1304 = vmatpush3.bf16.msra.mxu1 %v852_v36  ;;  %1305 = vmatprep.mubr.msk.bf16.mxu1 %vm1382_vm0, %v1381_v1 }
 0x384   : > { %1315 = vmatprep.subr.bf16.mxu1 %v1381_v1  ;;  %v1370_v40 = vpop.eup %1369 }
 0x385   : > { %v956_v42 = vmul.f32 %v1370_v40, %v1362_v19 }
 0x387   : > { %v957_v43 = vpack.c.bf16 %v956_v42, %v956_v42 }
 0x38a   : > { %1306 = vmatmul.mubr.msk.bf16.vlgmr.msra.gmra.mrb[12].mxu1 %vm557_vm2, %v845_v39 }
 0x38b   : > { %1316 = vmatpush3.bf16.msra.mxu1 %v964_v41  ;;  %1317 = vmatprep.mubr.msk.bf16.mxu1 %vm1382_vm0, %v1381_v1 }
 0x392   : > { %1318 = vmatmul.mubr.msk.bf16.vlgmr.msra.gmra.mrb[16].mxu1 %vm557_vm2, %v957_v43 }
 0x3da   : > { %v663_v44 = vpop.f32.mrb[4].mxu1 }
 0x3db   : > { %v1283_v45 = vpop.f32.mrb[5].mxu1 }
 0x3dc   : > { %v666_v46 = vpop.f32.mrb[6].mxu1 }
 0x3dd   : > { %v1284_v47 = vpop.f32.mrb[7].mxu1 }
 0x455   : > { %v776_v49 = vpop.f32.mrb[8].mxu1 }
 0x456   : > { %1007 = vrot.lane.b32.xlu0 %v776_v49, %s1390_s14  ;;  %v1295_v50 = vpop.f32.mrb[9].mxu1 }
 0x457   : > { %v779_v51 = vpop.f32.mrb[10].mxu1 }
 0x458   : > { %v1296_v52 = vpop.f32.mrb[11].mxu1 }
 0x45d   : > { %v888_v54 = vpop.f32.mrb[12].mxu1 }
 0x45e   : > { %1011 = vrot.lane.b32.xlu1 %v888_v54, %s1391_s18  ;;  %v1307_v55 = vpop.f32.mrb[13].mxu1 }
 0x45f   : > { %v891_v56 = vpop.f32.mrb[14].mxu1 }
 0x460   : > { %v1308_v57 = vpop.f32.mrb[15].mxu1 }
 0x465   : > { %v1000_v58 = vpop.f32.mrb[16].mxu1 }
 0x466   : > { %1015 = vrot.lane.b32.xlu0 %v1000_v58, %s1392_s19  ;;  %v1319_v1 = vpop.f32.mrb[17].mxu1 }
 0x467   : > { %v1003_v59 = vpop.f32.mrb[18].mxu1 }
 0x468   : > { %v1320_v60 = vpop.f32.mrb[19].mxu1 }
 0x4c8   : > { %v1008_v61 = vpop.permute.xlu0 %1007 }
 0x4c9   : > { %v1018_v63 = vsel %vm557_vm2, %v663_v44, %v1008_v61 }
 0x4d0   : > { %v1012_v62 = vpop.permute.xlu1 %1011 }
 0x4d1   : > { %v1020_v0 = vsel %vm1019_vm5, %v1018_v63, %v1012_v62 }
 0x4d8   : > { %v1016_v2 = vpop.permute.xlu0 %1015 }
 0x4d9   : > { %v1022_v3 = vsel %vm1021_vm6, %v1020_v0, %v1016_v2 }
 0x4da   : > { %v1023_v4 = vpack.c.bf16 %v1022_v3, %v1022_v3 }
 0x4dc   : > { %1326 = vmatmul.mubr.msk.bf16.vlgmr.msra.gmra.mrb[20].mxu0 %vm445_vm1, %v1023_v4 }
 0x5af   : > { %v1084_v6 = vpop.f32.mrb[20].mxu0 }
 0x5b0   : > { %v1085_v8 = vadd.f32 %v1224_v5, %v1084_v6  ;;  %v1327_v9 = vpop.f32.mrb[21].mxu0 }
 0x5b1   : > { %v1087_v10 = vpop.f32.mrb[22].mxu0 }
 0x5b2   : > { %v1328_v11 = vpop.f32.mrb[23].mxu0  ;;  %v1090_v12 = vadd.f32 %v1085_v8, %v1493_v7  ;;  %v1228_v7 = vld [vmem:[%s1610_s9] ss:$0 sm:$0xff] }
 0x5b4   : > { %v1091_v13 = vsel %vm445_vm1, %v1090_v12, 0.0 }
 0x5b5   : > { %1092 = vadd.xlane.f32.xlu1 %v1091_v13 }
 0x642   : > { %v1093_v14 = vpop.xlane.xlu1 %1092 }
 0x643   : > { %v1095_v15 = vmul.f32 0.03125, %v1093_v14 }
 0x645   : > { %v1096_v16 = vsub.f32 %v1090_v12, %v1095_v15 }
 0x647   : > { %v1097_v17 = vmul.f32 %v1096_v16, %v1096_v16 }
 0x649   : > { %v1098_v19 = vsel %vm445_vm1, %v1097_v17, 0.0 }
 0x64a   : > { %1099 = vadd.xlane.f32.xlu0 %v1098_v19 }
 0x6d7   : > { %v1100_v20 = vpop.xlane.xlu0 %1099 }
 0x6d8   : > { %v1101_v21 = vmul.f32 0.03125, %v1100_v20 }
 0x6da   : > { %v1102_v22 = vadd.f32 1e-05, %v1101_v21 }
 0x6dc   : > { %1371 = vrsqrt.f32 %v1102_v22 }
 0x6e6   : > { %v1372_v23 = vpop.eup %1371 }
 0x6e7   : > { %v1104_v24 = vmul.f32 %v1372_v23, %v1096_v16 }
 0x6e9   : > { %v1112_v26 = vmul.f32 %v1228_v7, %v1104_v24 }
 0x6eb   : > { %v1120_v27 = vadd.f32 %v1229_v25, %v1112_v26 }
 0x6ed   : > { %1121 = vst.msk [vmem:[%s415_s29] sm:$0xff] %vm445_vm1, %v1120_v27 }
 0x6ee PF: > { %s21_s17 = sadd.s32 1, %s1379_s17  }
 0x6ef   : > { %p18_p4 = scmp.ge.s32.totalorder %s21_s17, 4  }
 0x6f1   :  { %20 = sbr.rel (!%p18_p4) target bundleno = 1 (0x1), region = 100 }

</bundles_post_ra>
